<compile_context>
chip_gen: v5e
topology: v5e:2x2
jax: 0.10.0
libtpu: 0.0.40
codegen_flags: <defaults>
</compile_context>

<pallas_src>
import numpy as np
import jax
import jax.numpy as jnp
from jax.experimental import pallas as pl
from jax.experimental.pallas import tpu as pltpu

NEG_SLOPE = 0.2
MASK_VAL = -1e30


# ----------------------------------------------------------------------------
# Fused Pallas kernel
# ----------------------------------------------------------------------------
def _masked_softmax_rows(logits, adj_bias):
    """Row-wise softmax of LeakyReLU(logits) restricted to edges (additive mask)."""
    s = jnp.maximum(logits, NEG_SLOPE * logits) + adj_bias       # LeakyReLU + mask (VALU)
    m = jnp.max(s, axis=-1, keepdims=True)                       # finite (self-loops)
    p = jnp.exp(s - m)                                           # masked -> exp(-huge) = 0
    denom = jnp.sum(p, axis=-1, keepdims=True)                   # >= 1 (self-loops)
    return p * pl.reciprocal(denom, approx=True)                 # EUP reciprocal


def make_fused_kernel(heads1, hidden, mlp_hidden, out_dim):
    H1, C, MH = heads1, hidden, mlp_hidden
    HC = H1 * C

    def kernel(x_ref, adjb_ref, pool_ref, w1cat_ref, w2cat_ref, mwcat_ref, bias_ref,
               out_ref):
        adj_bias = adjb_ref[...]                                  # [N, N] f32 additive mask
        x = x_ref[...]                                            # [N, 8]  bf16

        # --------- GAT layer 1 (heads=4, concat=True): one fused prologue matmul ---------
        y1 = jnp.dot(x, w1cat_ref[...], preferred_element_type=jnp.float32)   # [N, 640]
        xp1 = y1[:, :HC].astype(jnp.bfloat16)                     # hoisted cast, [N, 512]
        a_dst1 = y1[:, HC:HC + H1]                                # [N, H]
        a_src1_t = jnp.transpose(y1[:, HC + H1:HC + 2 * H1])      # [H, N] tiny XLU transpose

        # H1 is tiny & static -> static unroll keeps every slice lane-aligned/static.
        head_outs = []
        for h in range(H1):
            logits = a_dst1[:, h:h + 1] + a_src1_t[h:h + 1, :]    # [N, N]
            attn = _masked_softmax_rows(logits, adj_bias)
            head_outs.append(jnp.dot(attn.astype(jnp.bfloat16),
                                     xp1[:, h * C:(h + 1) * C],
                                     preferred_element_type=jnp.float32))     # [N, C]
        h1 = jnp.concatenate(head_outs, axis=-1)                  # [N, HC] (registers only)
        h1 = jnp.maximum(h1 + bias_ref[:, :HC], 0.0)              # bias + ReLU, lane-dense
        h1b = h1.astype(jnp.bfloat16)

        # --------- GAT layer 2 (heads=1): one fused prologue matmul ---------
        y2 = jnp.dot(h1b, w2cat_ref[...], preferred_element_type=jnp.float32)  # [N, 256]
        xp2 = y2[:, :C].astype(jnp.bfloat16)                      # [N, C]
        # single tiny [N,1]->[1,N] transpose (depends on relu(h1), cannot be host-side)
        logits2 = y2[:, C:C + 1] + jnp.transpose(y2[:, C + 1:C + 2])            # [N, N]
        attn2 = _masked_softmax_rows(logits2, adj_bias)
        h2 = jnp.dot(attn2.astype(jnp.bfloat16), xp2, preferred_element_type=jnp.float32)
        h2 = jnp.maximum(h2 + bias_ref[:, HC:HC + C], 0.0)        # [N, C] f32

        # --------- global mean pool (exact, f32) + MLP ---------
        pooled = jnp.dot(pool_ref[...], h2, preferred_element_type=jnp.float32)  # [B, C]
        mid = jnp.dot(pooled.astype(jnp.bfloat16), mwcat_ref[:, :MH],
                      preferred_element_type=jnp.float32) + bias_ref[:, HC + C:HC + C + MH]
        mid = jnp.maximum(mid, 0.0)
        out_ref[...] = (jnp.dot(mid.astype(jnp.bfloat16), mwcat_ref[:, MH:MH + out_dim],
                                preferred_element_type=jnp.float32)
                        + bias_ref[:, HC + C + MH:HC + C + MH + out_dim])

    return kernel


# ----------------------------------------------------------------------------
# Wrapper
# ----------------------------------------------------------------------------
def _vmem():
    return pl.BlockSpec(memory_space=pltpu.MemorySpace.VMEM)


def gat_performance_model_forward(params, x_pad, adj_bias, pool_mat, *,
                                  heads1=4, hidden=128, mlp_hidden=128, out_dim=4):
    B = pool_mat.shape[0]
    kernel = make_fused_kernel(heads1, hidden, mlp_hidden, out_dim)
    inputs = (x_pad, adj_bias, pool_mat,
              params["w1cat"], params["w2cat"], params["mwcat"], params["bias"])
    return pl.pallas_call(
        kernel,
        out_shape=jax.ShapeDtypeStruct((B, out_dim), jnp.float32),
        in_specs=[_vmem() for _ in inputs],
        out_specs=_vmem(),
        compiler_params=pltpu.CompilerParams(vmem_limit_bytes=32 * 1024 * 1024),
    )(*inputs)


# ----------------------------------------------------------------------------
# Host-side parameter / graph construction (plain JAX / numpy)
# ----------------------------------------------------------------------------
def glorot(key, shape):
    fan_in, fan_out = shape[0], shape[-1]
    limit = float(np.sqrt(6.0 / (fan_in + fan_out)))
    return jax.random.uniform(key, shape, jnp.float32, -limit, limit)


def fold_att(w, att):
    """w: [F, H*C], att: [H, C] -> [F, H]; folds the per-head attention reduction
    into the linear weight so alpha = x @ (W folded with att)."""
    F = w.shape[0]
    H, C = att.shape
    return jnp.einsum("fhc,hc->fh", w.reshape(F, H, C), att)


def build_adj_bias(edge_index, num_nodes):
    """Additive mask: 0 where edge j -> i (self-loops added, PyG default), -1e30 else."""
    adj = np.zeros((num_nodes, num_nodes), dtype=np.float32)
    src, dst = edge_index
    adj[dst, src] = 1.0
    np.fill_diagonal(adj, 1.0)
    return jnp.asarray(np.where(adj > 0, 0.0, MASK_VAL).astype(np.float32))


def build_pool_mat(batch, num_graphs):
    batch = np.asarray(batch)
    P = np.zeros((num_graphs, batch.shape[0]), dtype=np.float32)
    for b in range(num_graphs):
        idx = np.where(batch == b)[0]
        P[b, idx] = 1.0 / len(idx)
    return jnp.asarray(P)                                        # f32: exact mean pooling


# ----------------------------------------------------------------------------
# Main
# ----------------------------------------------------------------------------
if __name__ == "__main__":
    in_dim, hidden_dim, out_dim = 6, 128, 4
    heads1 = 4
    mlp_hidden = hidden_dim
    F_PAD = 8            # zero-pad contraction dim of the first matmul (exact)
    N = 16               # total nodes (2 graphs x 8 nodes)
    B = 2                # graphs in the batch
    HC = heads1 * hidden_dim                                     # 512

    key = jax.random.PRNGKey(0)
    ks = jax.random.split(key, 12)

    # ---- deterministic parameters ----
    w1 = glorot(ks[0], (in_dim, HC))
    att_src1 = glorot(ks[1], (heads1, hidden_dim))
    att_dst1 = glorot(ks[2], (heads1, hidden_dim))
    w2 = glorot(ks[3], (HC, hidden_dim))
    att_src2 = glorot(ks[4], (1, hidden_dim))
    att_dst2 = glorot(ks[5], (1, hidden_dim))
    mlp_w1 = glorot(ks[6], (hidden_dim, mlp_hidden))
    mlp_w2 = glorot(ks[7], (mlp_hidden, out_dim))
    mlp_b1 = jax.random.uniform(ks[9], (mlp_hidden,), jnp.float32, -0.05, 0.05)
    mlp_b2 = jax.random.uniform(ks[10], (out_dim,), jnp.float32, -0.05, 0.05)
    # GATConv biases (PyG zero-init)
    b1 = np.zeros((HC,), np.float32)
    b2 = np.zeros((hidden_dim,), np.float32)

    # fold attention vectors into the linear weights (removes block-diag matmuls)
    wsrc1 = np.asarray(fold_att(w1, att_src1))       # [in_dim, 4]
    wdst1 = np.asarray(fold_att(w1, att_dst1))       # [in_dim, 4]
    wsrc2 = np.asarray(fold_att(w2, att_src2))       # [512, 1]
    wdst2 = np.asarray(fold_att(w2, att_dst2))       # [512, 1]

    bf = jnp.bfloat16

    # --- fused layer-1 weight: [xp1 | a_dst1 | a_src1 | pad] -> [8, 640] ---
    w1cat = np.zeros((F_PAD, HC + 128), np.float32)
    w1cat[:in_dim, :HC] = np.asarray(w1)
    w1cat[:in_dim, HC:HC + heads1] = wdst1
    w1cat[:in_dim, HC + heads1:HC + 2 * heads1] = wsrc1

    # --- fused layer-2 weight: [xp2 | a_dst2 | a_src2 | pad] -> [512, 256] ---
    w2cat = np.zeros((HC, 2 * hidden_dim), np.float32)
    w2cat[:, :hidden_dim] = np.asarray(w2)
    w2cat[:, hidden_dim] = wdst2[:, 0]
    w2cat[:, hidden_dim + 1] = wsrc2[:, 0]

    # --- packed MLP weights: [mlp_w1 | mlp_w2] -> [128, 132] ---
    mwcat = np.zeros((hidden_dim, mlp_hidden + out_dim), np.float32)
    mwcat[:, :mlp_hidden] = np.asarray(mlp_w1)
    mwcat[:, mlp_hidden:] = np.asarray(mlp_w2)

    # --- all biases packed into one f32 row: [b1 | b2 | mb1 | mb2 | pad] -> [1, 896] ---
    bias = np.zeros((1, HC + hidden_dim + mlp_hidden + 128), np.float32)
    bias[0, :HC] = b1
    bias[0, HC:HC + hidden_dim] = b2
    bias[0, HC + hidden_dim:HC + hidden_dim + mlp_hidden] = np.asarray(mlp_b1)
    bias[0, HC + hidden_dim + mlp_hidden:
            HC + hidden_dim + mlp_hidden + out_dim] = np.asarray(mlp_b2)

    params = dict(
        w1cat=jnp.asarray(w1cat, bf),                 # [8, 640]
        w2cat=jnp.asarray(w2cat, bf),                 # [512, 256]
        mwcat=jnp.asarray(mwcat, bf),                 # [128, 132]
        bias=jnp.asarray(bias),                       # [1, 896] f32
    )

    # ---- deterministic example graph batch ----
    x = jax.random.normal(ks[8], (N, in_dim), jnp.float32)         # data.x
    x_pad = jnp.pad(x, ((0, 0), (0, F_PAD - in_dim))).astype(bf)   # [N, 8] bf16

    # two 8-node ring graphs, bidirectional edges  -> data.edge_index [2, E]
    src, dst = [], []
    for g in range(B):
        base = g * 8
        for i in range(8):
            a, b_ = base + i, base + (i + 1) % 8
            src += [a, b_]
            dst += [b_, a]
    edge_index = np.stack([np.array(src), np.array(dst)])          # [2, 32]
    batch = np.repeat(np.arange(B), 8)                             # data.batch

    adj_bias = build_adj_bias(edge_index, N)                       # [N, N] f32 additive mask
    pool_mat = build_pool_mat(batch, B)                            # [B, N] f32

    out = gat_performance_model_forward(params, x_pad, adj_bias, pool_mat,
                                        heads1=heads1, hidden=hidden_dim,
                                        mlp_hidden=mlp_hidden, out_dim=out_dim)
    out = jax.block_until_ready(out)
    assert out.shape == (B, out_dim)
    assert bool(jnp.all(jnp.isfinite(out)))
    print("KERNEL_OK")
</pallas_src>

<mosaic_0001>
module attributes {stable_mosaic.version = 11 : i64} {
  func.func @kernel(%arg0: memref<16x8xbf16, #tpu.memory_space<vmem>>, %arg1: memref<16x16xf32, #tpu.memory_space<vmem>>, %arg2: memref<2x16xf32, #tpu.memory_space<vmem>>, %arg3: memref<8x640xbf16, #tpu.memory_space<vmem>>, %arg4: memref<512x256xbf16, #tpu.memory_space<vmem>>, %arg5: memref<128x132xbf16, #tpu.memory_space<vmem>>, %arg6: memref<1x896xf32, #tpu.memory_space<vmem>>, %arg7: memref<2x4xf32, #tpu.memory_space<vmem>>) attributes {dimension_semantics = [], scalar_prefetch = 0 : i64, scratch_operands = 0 : i64, tpu.core_type = #tpu.core_type<tc>} {
    %c0 = arith.constant 0 : index
    %c0_0 = arith.constant 0 : index
    %0 = vector.load %arg1[%c0, %c0_0] : memref<16x16xf32, #tpu.memory_space<vmem>>, vector<16x16xf32>
    %c0_1 = arith.constant 0 : index
    %c0_2 = arith.constant 0 : index
    %1 = vector.load %arg0[%c0_1, %c0_2] : memref<16x8xbf16, #tpu.memory_space<vmem>>, vector<16x8xbf16>
    %c0_3 = arith.constant 0 : index
    %c0_4 = arith.constant 0 : index
    %2 = vector.load %arg3[%c0_3, %c0_4] : memref<8x640xbf16, #tpu.memory_space<vmem>>, vector<8x640xbf16>
    %cst = arith.constant dense<0.000000e+00> : vector<16x640xf32>
    %3 = tpu.matmul %1, %2, %cst {dimension_numbers = #tpu.dot_dimension_numbers<[1], [0], [0], [1], [0, 0, 1, 1], [], []>} : vector<16x8xbf16>, vector<8x640xbf16>, vector<16x640xf32> -> vector<16x640xf32>
    %4 = vector.extract_strided_slice %3 {offsets = [0, 0], sizes = [16, 512], strides = [1, 1]} : vector<16x640xf32> to vector<16x512xf32>
    %5 = arith.truncf %4 : vector<16x512xf32> to vector<16x512xbf16>
    %6 = vector.extract_strided_slice %3 {offsets = [0, 512], sizes = [16, 4], strides = [1, 1]} : vector<16x640xf32> to vector<16x4xf32>
    %7 = vector.extract_strided_slice %3 {offsets = [0, 516], sizes = [16, 4], strides = [1, 1]} : vector<16x640xf32> to vector<16x4xf32>
    %8 = tpu.transpose %7, [1, 0] : vector<16x4xf32> -> vector<4x16xf32>
    %9 = vector.extract_strided_slice %6 {offsets = [0, 0], sizes = [16, 1], strides = [1, 1]} : vector<16x4xf32> to vector<16x1xf32>
    %10 = vector.extract_strided_slice %8 {offsets = [0, 0], sizes = [1, 16], strides = [1, 1]} : vector<4x16xf32> to vector<1x16xf32>
    %11 = vector.broadcast %9 : vector<16x1xf32> to vector<16x16xf32>
    %12 = vector.broadcast %10 : vector<1x16xf32> to vector<16x16xf32>
    %13 = arith.addf %11, %12 : vector<16x16xf32>
    %cst_5 = arith.constant 2.000000e-01 : f32
    %14 = vector.broadcast %cst_5 : f32 to vector<16x16xf32>
    %15 = arith.mulf %14, %13 : vector<16x16xf32>
    %16 = arith.maximumf %13, %15 : vector<16x16xf32>
    %17 = arith.addf %16, %0 : vector<16x16xf32>
    %cst_6 = arith.constant dense<0xFF800000> : vector<16xf32>
    %18 = vector.multi_reduction <maximumf>, %17, %cst_6 [1] : vector<16x16xf32> to vector<16xf32>
    %19 = vector.shape_cast %18 : vector<16xf32> to vector<16x1xf32>
    %20 = vector.broadcast %19 : vector<16x1xf32> to vector<16x16xf32>
    %21 = arith.subf %17, %20 : vector<16x16xf32>
    %22 = math.exp %21 : vector<16x16xf32>
    %cst_7 = arith.constant dense<0.000000e+00> : vector<16xf32>
    %23 = vector.multi_reduction <add>, %22, %cst_7 [1] : vector<16x16xf32> to vector<16xf32>
    %24 = vector.shape_cast %23 : vector<16xf32> to vector<16x1xf32>
    %25 = tpu.reciprocal %24 {approx = true} : vector<16x1xf32> -> vector<16x1xf32>
    %26 = vector.broadcast %25 : vector<16x1xf32> to vector<16x16xf32>
    %27 = arith.mulf %22, %26 : vector<16x16xf32>
    %28 = arith.truncf %27 : vector<16x16xf32> to vector<16x16xbf16>
    %29 = vector.extract_strided_slice %5 {offsets = [0, 0], sizes = [16, 128], strides = [1, 1]} : vector<16x512xbf16> to vector<16x128xbf16>
    %cst_8 = arith.constant dense<0.000000e+00> : vector<16x128xf32>
    %30 = tpu.matmul %28, %29, %cst_8 {dimension_numbers = #tpu.dot_dimension_numbers<[1], [0], [0], [1], [0, 0, 1, 1], [], []>} : vector<16x16xbf16>, vector<16x128xbf16>, vector<16x128xf32> -> vector<16x128xf32>
    %31 = vector.extract_strided_slice %6 {offsets = [0, 1], sizes = [16, 1], strides = [1, 1]} : vector<16x4xf32> to vector<16x1xf32>
    %32 = vector.extract_strided_slice %8 {offsets = [1, 0], sizes = [1, 16], strides = [1, 1]} : vector<4x16xf32> to vector<1x16xf32>
    %33 = vector.broadcast %31 : vector<16x1xf32> to vector<16x16xf32>
    %34 = vector.broadcast %32 : vector<1x16xf32> to vector<16x16xf32>
    %35 = arith.addf %33, %34 : vector<16x16xf32>
    %cst_9 = arith.constant 2.000000e-01 : f32
    %36 = vector.broadcast %cst_9 : f32 to vector<16x16xf32>
    %37 = arith.mulf %36, %35 : vector<16x16xf32>
    %38 = arith.maximumf %35, %37 : vector<16x16xf32>
    %39 = arith.addf %38, %0 : vector<16x16xf32>
    %cst_10 = arith.constant dense<0xFF800000> : vector<16xf32>
    %40 = vector.multi_reduction <maximumf>, %39, %cst_10 [1] : vector<16x16xf32> to vector<16xf32>
    %41 = vector.shape_cast %40 : vector<16xf32> to vector<16x1xf32>
    %42 = vector.broadcast %41 : vector<16x1xf32> to vector<16x16xf32>
    %43 = arith.subf %39, %42 : vector<16x16xf32>
    %44 = math.exp %43 : vector<16x16xf32>
    %cst_11 = arith.constant dense<0.000000e+00> : vector<16xf32>
    %45 = vector.multi_reduction <add>, %44, %cst_11 [1] : vector<16x16xf32> to vector<16xf32>
    %46 = vector.shape_cast %45 : vector<16xf32> to vector<16x1xf32>
    %47 = tpu.reciprocal %46 {approx = true} : vector<16x1xf32> -> vector<16x1xf32>
    %48 = vector.broadcast %47 : vector<16x1xf32> to vector<16x16xf32>
    %49 = arith.mulf %44, %48 : vector<16x16xf32>
    %50 = arith.truncf %49 : vector<16x16xf32> to vector<16x16xbf16>
    %51 = vector.extract_strided_slice %5 {offsets = [0, 128], sizes = [16, 128], strides = [1, 1]} : vector<16x512xbf16> to vector<16x128xbf16>
    %cst_12 = arith.constant dense<0.000000e+00> : vector<16x128xf32>
    %52 = tpu.matmul %50, %51, %cst_12 {dimension_numbers = #tpu.dot_dimension_numbers<[1], [0], [0], [1], [0, 0, 1, 1], [], []>} : vector<16x16xbf16>, vector<16x128xbf16>, vector<16x128xf32> -> vector<16x128xf32>
    %53 = vector.extract_strided_slice %6 {offsets = [0, 2], sizes = [16, 1], strides = [1, 1]} : vector<16x4xf32> to vector<16x1xf32>
    %54 = vector.extract_strided_slice %8 {offsets = [2, 0], sizes = [1, 16], strides = [1, 1]} : vector<4x16xf32> to vector<1x16xf32>
    %55 = vector.broadcast %53 : vector<16x1xf32> to vector<16x16xf32>
    %56 = vector.broadcast %54 : vector<1x16xf32> to vector<16x16xf32>
    %57 = arith.addf %55, %56 : vector<16x16xf32>
    %cst_13 = arith.constant 2.000000e-01 : f32
    %58 = vector.broadcast %cst_13 : f32 to vector<16x16xf32>
    %59 = arith.mulf %58, %57 : vector<16x16xf32>
    %60 = arith.maximumf %57, %59 : vector<16x16xf32>
    %61 = arith.addf %60, %0 : vector<16x16xf32>
    %cst_14 = arith.constant dense<0xFF800000> : vector<16xf32>
    %62 = vector.multi_reduction <maximumf>, %61, %cst_14 [1] : vector<16x16xf32> to vector<16xf32>
    %63 = vector.shape_cast %62 : vector<16xf32> to vector<16x1xf32>
    %64 = vector.broadcast %63 : vector<16x1xf32> to vector<16x16xf32>
    %65 = arith.subf %61, %64 : vector<16x16xf32>
    %66 = math.exp %65 : vector<16x16xf32>
    %cst_15 = arith.constant dense<0.000000e+00> : vector<16xf32>
    %67 = vector.multi_reduction <add>, %66, %cst_15 [1] : vector<16x16xf32> to vector<16xf32>
    %68 = vector.shape_cast %67 : vector<16xf32> to vector<16x1xf32>
    %69 = tpu.reciprocal %68 {approx = true} : vector<16x1xf32> -> vector<16x1xf32>
    %70 = vector.broadcast %69 : vector<16x1xf32> to vector<16x16xf32>
    %71 = arith.mulf %66, %70 : vector<16x16xf32>
    %72 = arith.truncf %71 : vector<16x16xf32> to vector<16x16xbf16>
    %73 = vector.extract_strided_slice %5 {offsets = [0, 256], sizes = [16, 128], strides = [1, 1]} : vector<16x512xbf16> to vector<16x128xbf16>
    %cst_16 = arith.constant dense<0.000000e+00> : vector<16x128xf32>
    %74 = tpu.matmul %72, %73, %cst_16 {dimension_numbers = #tpu.dot_dimension_numbers<[1], [0], [0], [1], [0, 0, 1, 1], [], []>} : vector<16x16xbf16>, vector<16x128xbf16>, vector<16x128xf32> -> vector<16x128xf32>
    %75 = vector.extract_strided_slice %6 {offsets = [0, 3], sizes = [16, 1], strides = [1, 1]} : vector<16x4xf32> to vector<16x1xf32>
    %76 = vector.extract_strided_slice %8 {offsets = [3, 0], sizes = [1, 16], strides = [1, 1]} : vector<4x16xf32> to vector<1x16xf32>
    %77 = vector.broadcast %75 : vector<16x1xf32> to vector<16x16xf32>
    %78 = vector.broadcast %76 : vector<1x16xf32> to vector<16x16xf32>
    %79 = arith.addf %77, %78 : vector<16x16xf32>
    %cst_17 = arith.constant 2.000000e-01 : f32
    %80 = vector.broadcast %cst_17 : f32 to vector<16x16xf32>
    %81 = arith.mulf %80, %79 : vector<16x16xf32>
    %82 = arith.maximumf %79, %81 : vector<16x16xf32>
    %83 = arith.addf %82, %0 : vector<16x16xf32>
    %cst_18 = arith.constant dense<0xFF800000> : vector<16xf32>
    %84 = vector.multi_reduction <maximumf>, %83, %cst_18 [1] : vector<16x16xf32> to vector<16xf32>
    %85 = vector.shape_cast %84 : vector<16xf32> to vector<16x1xf32>
    %86 = vector.broadcast %85 : vector<16x1xf32> to vector<16x16xf32>
    %87 = arith.subf %83, %86 : vector<16x16xf32>
    %88 = math.exp %87 : vector<16x16xf32>
    %cst_19 = arith.constant dense<0.000000e+00> : vector<16xf32>
    %89 = vector.multi_reduction <add>, %88, %cst_19 [1] : vector<16x16xf32> to vector<16xf32>
    %90 = vector.shape_cast %89 : vector<16xf32> to vector<16x1xf32>
    %91 = tpu.reciprocal %90 {approx = true} : vector<16x1xf32> -> vector<16x1xf32>
    %92 = vector.broadcast %91 : vector<16x1xf32> to vector<16x16xf32>
    %93 = arith.mulf %88, %92 : vector<16x16xf32>
    %94 = arith.truncf %93 : vector<16x16xf32> to vector<16x16xbf16>
    %95 = vector.extract_strided_slice %5 {offsets = [0, 384], sizes = [16, 128], strides = [1, 1]} : vector<16x512xbf16> to vector<16x128xbf16>
    %cst_20 = arith.constant dense<0.000000e+00> : vector<16x128xf32>
    %96 = tpu.matmul %94, %95, %cst_20 {dimension_numbers = #tpu.dot_dimension_numbers<[1], [0], [0], [1], [0, 0, 1, 1], [], []>} : vector<16x16xbf16>, vector<16x128xbf16>, vector<16x128xf32> -> vector<16x128xf32>
    %97 = tpu.concatenate %30, %52, %74, %96 in 1 : vector<16x128xf32>, vector<16x128xf32>, vector<16x128xf32>, vector<16x128xf32> -> vector<16x512xf32>
    %c0_21 = arith.constant 0 : index
    %c0_22 = arith.constant 0 : index
    %98 = vector.load %arg6[%c0_21, %c0_22] : memref<1x896xf32, #tpu.memory_space<vmem>>, vector<1x512xf32>
    %99 = vector.broadcast %98 : vector<1x512xf32> to vector<16x512xf32>
    %100 = arith.addf %97, %99 : vector<16x512xf32>
    %cst_23 = arith.constant 0.000000e+00 : f32
    %101 = vector.broadcast %cst_23 : f32 to vector<16x512xf32>
    %102 = arith.maximumf %100, %101 : vector<16x512xf32>
    %103 = arith.truncf %102 : vector<16x512xf32> to vector<16x512xbf16>
    %c0_24 = arith.constant 0 : index
    %c0_25 = arith.constant 0 : index
    %104 = vector.load %arg4[%c0_24, %c0_25] : memref<512x256xbf16, #tpu.memory_space<vmem>>, vector<512x256xbf16>
    %cst_26 = arith.constant dense<0.000000e+00> : vector<16x256xf32>
    %105 = tpu.matmul %103, %104, %cst_26 {dimension_numbers = #tpu.dot_dimension_numbers<[1], [0], [0], [1], [0, 0, 1, 1], [], []>} : vector<16x512xbf16>, vector<512x256xbf16>, vector<16x256xf32> -> vector<16x256xf32>
    %106 = vector.extract_strided_slice %105 {offsets = [0, 0], sizes = [16, 128], strides = [1, 1]} : vector<16x256xf32> to vector<16x128xf32>
    %107 = arith.truncf %106 : vector<16x128xf32> to vector<16x128xbf16>
    %108 = vector.extract_strided_slice %105 {offsets = [0, 128], sizes = [16, 1], strides = [1, 1]} : vector<16x256xf32> to vector<16x1xf32>
    %109 = vector.extract_strided_slice %105 {offsets = [0, 129], sizes = [16, 1], strides = [1, 1]} : vector<16x256xf32> to vector<16x1xf32>
    %110 = tpu.transpose %109, [1, 0] : vector<16x1xf32> -> vector<1x16xf32>
    %111 = vector.broadcast %108 : vector<16x1xf32> to vector<16x16xf32>
    %112 = vector.broadcast %110 : vector<1x16xf32> to vector<16x16xf32>
    %113 = arith.addf %111, %112 : vector<16x16xf32>
    %cst_27 = arith.constant 2.000000e-01 : f32
    %114 = vector.broadcast %cst_27 : f32 to vector<16x16xf32>
    %115 = arith.mulf %114, %113 : vector<16x16xf32>
    %116 = arith.maximumf %113, %115 : vector<16x16xf32>
    %117 = arith.addf %116, %0 : vector<16x16xf32>
    %cst_28 = arith.constant dense<0xFF800000> : vector<16xf32>
    %118 = vector.multi_reduction <maximumf>, %117, %cst_28 [1] : vector<16x16xf32> to vector<16xf32>
    %119 = vector.shape_cast %118 : vector<16xf32> to vector<16x1xf32>
    %120 = vector.broadcast %119 : vector<16x1xf32> to vector<16x16xf32>
    %121 = arith.subf %117, %120 : vector<16x16xf32>
    %122 = math.exp %121 : vector<16x16xf32>
    %cst_29 = arith.constant dense<0.000000e+00> : vector<16xf32>
    %123 = vector.multi_reduction <add>, %122, %cst_29 [1] : vector<16x16xf32> to vector<16xf32>
    %124 = vector.shape_cast %123 : vector<16xf32> to vector<16x1xf32>
    %125 = tpu.reciprocal %124 {approx = true} : vector<16x1xf32> -> vector<16x1xf32>
    %126 = vector.broadcast %125 : vector<16x1xf32> to vector<16x16xf32>
    %127 = arith.mulf %122, %126 : vector<16x16xf32>
    %128 = arith.truncf %127 : vector<16x16xf32> to vector<16x16xbf16>
    %cst_30 = arith.constant dense<0.000000e+00> : vector<16x128xf32>
    %129 = tpu.matmul %128, %107, %cst_30 {dimension_numbers = #tpu.dot_dimension_numbers<[1], [0], [0], [1], [0, 0, 1, 1], [], []>} : vector<16x16xbf16>, vector<16x128xbf16>, vector<16x128xf32> -> vector<16x128xf32>
    %c0_31 = arith.constant 0 : index
    %c512 = arith.constant 512 : index
    %130 = vector.load %arg6[%c0_31, %c512] : memref<1x896xf32, #tpu.memory_space<vmem>>, vector<1x128xf32>
    %131 = vector.broadcast %130 : vector<1x128xf32> to vector<16x128xf32>
    %132 = arith.addf %129, %131 : vector<16x128xf32>
    %cst_32 = arith.constant 0.000000e+00 : f32
    %133 = vector.broadcast %cst_32 : f32 to vector<16x128xf32>
    %134 = arith.maximumf %132, %133 : vector<16x128xf32>
    %c0_33 = arith.constant 0 : index
    %c0_34 = arith.constant 0 : index
    %135 = vector.load %arg2[%c0_33, %c0_34] : memref<2x16xf32, #tpu.memory_space<vmem>>, vector<2x16xf32>
    %cst_35 = arith.constant dense<0.000000e+00> : vector<2x128xf32>
    %136 = tpu.matmul %135, %134, %cst_35 {dimension_numbers = #tpu.dot_dimension_numbers<[1], [0], [0], [1], [0, 0, 1, 1], [], []>} : vector<2x16xf32>, vector<16x128xf32>, vector<2x128xf32> -> vector<2x128xf32>
    %137 = arith.truncf %136 : vector<2x128xf32> to vector<2x128xbf16>
    %c0_36 = arith.constant 0 : index
    %c0_37 = arith.constant 0 : index
    %138 = vector.load %arg5[%c0_36, %c0_37] : memref<128x132xbf16, #tpu.memory_space<vmem>>, vector<128x128xbf16>
    %cst_38 = arith.constant dense<0.000000e+00> : vector<2x128xf32>
    %139 = tpu.matmul %137, %138, %cst_38 {dimension_numbers = #tpu.dot_dimension_numbers<[1], [0], [0], [1], [0, 0, 1, 1], [], []>} : vector<2x128xbf16>, vector<128x128xbf16>, vector<2x128xf32> -> vector<2x128xf32>
    %c0_39 = arith.constant 0 : index
    %c640 = arith.constant 640 : index
    %140 = vector.load %arg6[%c0_39, %c640] : memref<1x896xf32, #tpu.memory_space<vmem>>, vector<1x128xf32>
    %141 = vector.broadcast %140 : vector<1x128xf32> to vector<2x128xf32>
    %142 = arith.addf %139, %141 : vector<2x128xf32>
    %cst_40 = arith.constant 0.000000e+00 : f32
    %143 = vector.broadcast %cst_40 : f32 to vector<2x128xf32>
    %144 = arith.maximumf %142, %143 : vector<2x128xf32>
    %145 = arith.truncf %144 : vector<2x128xf32> to vector<2x128xbf16>
    %c0_41 = arith.constant 0 : index
    %c128 = arith.constant 128 : index
    %146 = vector.load %arg5[%c0_41, %c128] : memref<128x132xbf16, #tpu.memory_space<vmem>>, vector<128x4xbf16>
    %cst_42 = arith.constant dense<0.000000e+00> : vector<2x4xf32>
    %147 = tpu.matmul %145, %146, %cst_42 {dimension_numbers = #tpu.dot_dimension_numbers<[1], [0], [0], [1], [0, 0, 1, 1], [], []>} : vector<2x128xbf16>, vector<128x4xbf16>, vector<2x4xf32> -> vector<2x4xf32>
    %c0_43 = arith.constant 0 : index
    %c768 = arith.constant 768 : index
    %148 = vector.load %arg6[%c0_43, %c768] : memref<1x896xf32, #tpu.memory_space<vmem>>, vector<1x4xf32>
    %149 = vector.broadcast %148 : vector<1x4xf32> to vector<2x4xf32>
    %150 = arith.addf %147, %149 : vector<2x4xf32>
    %c0_44 = arith.constant 0 : index
    %c0_45 = arith.constant 0 : index
    %151 = vector.load %arg7[%c0_44, %c0_45] : memref<2x4xf32, #tpu.memory_space<vmem>>, vector<2x4xf32>
    tpu.vector_store %arg7[%c0_44, %c0_45], %150 {strides = array<i32>} : memref<2x4xf32, #tpu.memory_space<vmem>>, vector<2x4xf32>,
    return
  }
}

</mosaic_0001>

<bundles_post_ra>
// kernel: tpu_custom_call.1
= control target key start
LH: loop header
LB: loop body
LE: loop exit
PB: predicated region body
PF: predicated region fallthrough
CT: control target
= control target key end

     0   :  { %12 = vsyncpa [#allocation3], 0  ;;  %s2114_s0 = inlined_call_operand.vmem [shape: bf16[16,8], index: 0, kind: input, shape index: {}]   ;;  %s2115_s1 = inlined_call_operand.vmem [shape: f32[16,16], index: 1, kind: input, shape index: {}]   ;;  %s2116_s2 = inlined_call_operand.vmem [shape: f32[2,16], index: 2, kind: input, shape index: {}]   ;;  %s2117_s3 = inlined_call_operand.vmem [shape: bf16[8,640], index: 3, kind: input, shape index: {}]   ;;  %s2118_s4 = inlined_call_operand.hbm [shape: bf16[512,256], index: 4, kind: input, shape index: {}]   ;;  %s2119_s5 = inlined_call_operand.vmem [shape: bf16[128,132], index: 5, kind: input, shape index: {}]   ;;  %s2120_s6 = inlined_call_operand.vmem [shape: f32[1,896], index: 6, kind: input, shape index: {}]   ;;  %s2121_s7 = inlined_call_operand.hbm [shape: f32[2,4], index: 7, kind: output, shape index: {}]  }
   0x1   :  { %13 = vsyncpa [#allocation4], 0  ;;  %s26_s26 = sshll.u32 %s2118_s4, 4  ;;  %s1822_s27 = smov [#allocation2]   ;;  %s27_s26 = int_to_ptr.hbm [resolvable:$true] %s26_s26 }
   0x2   :  { %s28_s28 = sshll.u32 %s1822_s27, 4  ;;  %s1823_s29 = smov 128   ;;  %s29_s28 = int_to_ptr.vmem [resolvable:$true] %s28_s28 }
   0x3   :  { %s1824_s30 = smov 8  }
   0x4   :  { %34 = dma.hbm_to_vmem [thread:$0]  %s27_s26, 8192, %s29_s28, [#allocation3], %s1823_s29, %s1823_s29, %s1824_s30  }
   0x5   :  { %1818 = dma.done.wait [#allocation3], 8192  }
   0x6   :  { %1819 = vsyncadd [#allocation3], 4294959104  ;;  %v1825_v0 = vmov 2   ;;  %v1826_v1 = vmov 1   ;;  %v50_v2 = vld [vmem:[%s2117_s3 + $0x10] sm:$0xf] }
   0x7   :  { %1718 = vset.pattern.permute.xlu2 %v1825_v0  ;;  %1717 = vset.pattern.permute.xlu1 %v1826_v1  ;;  %v63_v3 = vunpack.c.l.b16 %v50_v2  ;;  %vm73_vm0 = vcmask 1043456   ;;  %v1882_v6 = vld [vmem:[%s2114_s0] sm:$0xff]  ;;  %vm69_vm1 = vcmask 64512   ;;  %v1827_v7 = vmov 0   ;;  %s1828_s11 = smov 124   ;;  %v1895_v32 = vld [vmem:[%s2115_s1 + $0x8] sm:$0xff] }
   0x8   :  { %1719 = vset.pattern.permute.xlu0 %v1827_v7  ;;  %v1829_v10 = vmov 3   ;;  %v44_v33 = vld [vmem:[%s2115_s1] sm:$0xff]  ;;  %vm220_vm2 = vcmask 130048   ;;  %v49_v45 = vld [vmem:[%s2117_s3 + $0x8] sm:$0xff]  ;;  %s1830_s20 = smov 127   ;;  %s1831_s15 = smov [#allocation5]  }
   0x9   :  { %v68_v4 = vpack.c.b16 %v63_v3, %v63_v3  ;;  %v48_v44 = vld [vmem:[%s2117_s3] sm:$0xff]  ;;  %v61_v54 = vunpack.c.l.b16 %v49_v45  ;;  %v62_v56 = vunpack.c.h.b16 %v49_v45  ;;  %s1278_s16 = sshll.u32 %s1831_s15, 4  ;;  %s1280_s18 = sshll.u32 %s2121_s7, 4  ;;  %vm1271_vm3 = vcmask 25600   ;;  %s1279_s16 = int_to_ptr.vmem [resolvable:$true] %s1278_s16  ;;  %s1281_s18 = int_to_ptr.hbm [resolvable:$true] %s1280_s18 }
   0xa   :  { %v59_v52 = vunpack.c.l.b16 %v48_v44  ;;  %v60_v53 = vunpack.c.h.b16 %v48_v44 }
   0xb   :  { %v87_v5 = vsel %vm73_vm0, %v68_v4, 0  ;;  %v66_v60 = vpack.c.b16 %v61_v54, %v61_v54  ;;  %v67_v63 = vpack.c.b16 %v62_v56, %v62_v56 }
   0xc   :  { %152 = vmatpush.bf16.msra.mxu0 %v87_v5  ;;  %v64_v58 = vpack.c.b16 %v59_v52, %v59_v52  ;;  %v65_v59 = vpack.c.b16 %v60_v53, %v60_v53 }
   0xd   :  { %v81_v2 = vsel %vm73_vm0, %v66_v60, 0  ;;  %v84_v3 = vsel %vm73_vm0, %v67_v63, 0 }
   0xe   :  { %v78_v1 = vsel %vm73_vm0, %v65_v59, 0  ;;  %138 = vmatpush.bf16.msra.mxu3 %v84_v3 }
   0xf   :  { %1298 = vmatmul.msk.bf16.vlgmr.msra.gmra.mxu0 %vm69_vm1, %v1882_v6  ;;  %110 = vmatpush.bf16.msra.mxu1 %v78_v1 }
  0x11   :  { %1297 = vmatmul.msk.bf16.vlgmr.msra.gmra.mxu3 %vm69_vm1, %v1882_v6 }
  0x12   :  { %1295 = vmatmul.msk.bf16.vlgmr.msra.gmra.mxu1 %vm69_vm1, %v1882_v6 }
  0x8c   :  { %v154_v8 = vpop.f32.mrf.mxu0 }
  0x8d   :  { %329 = vperm.xlu2 %1718, %v154_v8   ;;  %268 = vperm.xlu1 %1717, %v154_v8  }
  0x8e   :  { %165 = vrot.lane.b32.xlu0 %v154_v8, %s1828_s11 }
  0x8f   :  { %v112_v45 = vpop.f32.mrf.mxu1 }
  0x94   :  { %v156_v9 = vpop.f32.mrf.mxu0 }
  0x95   :  { %1720 = vset.pattern.permute.xlu2 %v1829_v10  ;;  %272 = vperm.xlu1 %1717, %v156_v9  }
  0x96   :  { %167 = vrot.lane.b32.xlu0 %v156_v9, %s1828_s11  ;;  %392 = vperm.xlu2 %1720, %v154_v8  }
  0x9d   :  { %1722 = vset.pattern.permute.xlu1 %v1827_v7 }
  0x9e   :  { %204 = vperm.xlu0 %1719, %v154_v8   ;;  %1721 = vset.pattern.permute.xlu2 %v1825_v0  ;;  %v75_v0 = vsel %vm73_vm0, %v64_v58, 0 }
  0x9f   :  { %208 = vperm.xlu1 %1722, %v156_v9   ;;  %333 = vperm.xlu2 %1721, %v156_v9  }
  0xa0   :  { %96 = vmatpush.bf16.msra.mxu2 %v75_v0 }
  0xa3   :  { %1294 = vmatmul.msk.bf16.vlgmr.msra.gmra.mxu2 %vm69_vm1, %v1882_v6 }
  0xa4   :  { %124 = vmatpush.bf16.msrb.mxu2 %v81_v2 }
  0xa7   :  { %1723 = vset.pattern.permute.xlu1 %v1829_v10 }
  0xa8   :  { %396 = vperm.xlu1 %1723, %v156_v9  }
  0xb0   :  { %1724 = vset.pattern.permute.xlu1 %v1827_v7 }
  0xb3   :  { %1296 = vmatmul.msk.bf16.vlgmr.msrb.gmra.mxu2 %vm69_vm1, %v1882_v6 }
  0xe7   :  { %v330_v13 = vpop.permute.xlu2 %329 }
  0xf0   :  { %v393_v14 = vpop.permute.xlu2 %392 }
  0xf9   :  { %v334_v16 = vpop.permute.xlu2 %333 }
  0xff   :  { %v269_v15 = vpop.permute.xlu1 %268 }
 0x100   :  { %v166_v11 = vpop.permute.xlu0 %165 }
 0x101   :  { %171 = vxpose.xlu2.b32.start [1/2] (short) (narrow) %v166_v11, 8 }
 0x107   :  { %v273_v17 = vpop.permute.xlu1 %272 }
 0x108   :  { %v168_v12 = vpop.permute.xlu0 %167 }
 0x109   :  { %172 = vxpose.xlu2.b32.end [2/2] (short) (narrow) %v168_v12, 8 }
 0x110   :  { %v205_v22 = vpop.permute.xlu0 %204 }
 0x111   :  { %v209_v39 = vpop.permute.xlu1 %208 }
 0x11a   :  { %v397_v4 = vpop.permute.xlu1 %396 }
 0x19a   :  { %v1886_v18 = vpop.trf.xlu2 }
 0x19b   :  { %v211_v19 = vperm.slane %v1886_v18, 0  ;;  %v275_v20 = vperm.slane %v1886_v18, 1  ;;  %v336_v21 = vperm.slane %v1886_v18, 2  ;;  %v399_v31 = vperm.slane %v1886_v18, 3 }
 0x19d   :  { %v277_v23 = vadd.f32 %v275_v20, %v273_v17  ;;  %v337_v24 = vadd.f32 %v336_v21, %v330_v13  ;;  %v276_v25 = vadd.f32 %v275_v20, %v269_v15  ;;  %v338_v26 = vadd.f32 %v336_v21, %v334_v16 }
 0x19e   :  { %v212_v27 = vadd.f32 %v211_v19, %v205_v22  ;;  %v400_v43 = vadd.f32 %v399_v31, %v393_v14  ;;  %v213_v51 = vadd.f32 %v211_v19, %v209_v39  ;;  %v401_v10 = vadd.f32 %v399_v31, %v397_v4 }
 0x19f   :  { %v279_v28 = vmul.f32 0.2, %v277_v23  ;;  %v339_v29 = vmul.f32 0.2, %v337_v24  ;;  %v278_v30 = vmul.f32 0.2, %v276_v25 }
 0x1a0   :  { %v214_v37 = vmul.f32 0.2, %v212_v27  ;;  %v340_v38 = vmul.f32 0.2, %v338_v26  ;;  %v402_v55 = vmul.f32 0.2, %v400_v43 }
 0x1a1   :  { %v281_v34 = vmax.f32 %v277_v23, %v279_v28  ;;  %v341_v35 = vmax.f32 %v337_v24, %v339_v29  ;;  %v280_v36 = vmax.f32 %v276_v25, %v278_v30  ;;  %v215_v62 = vmul.f32 0.2, %v213_v51 }
 0x1a2   :  { %v216_v49 = vmax.f32 %v212_v27, %v214_v37  ;;  %v342_v50 = vmax.f32 %v338_v26, %v340_v38  ;;  %v404_v7 = vmax.f32 %v400_v43, %v402_v55  ;;  %v403_v13 = vmul.f32 0.2, %v401_v10 }
 0x1a3   :  { %v1901_v40 = vadd.f32 %v281_v34, %v1895_v32  ;;  %v1903_v41 = vadd.f32 %v341_v35, %v44_v33  ;;  %v282_v42 = vadd.f32 %v280_v36, %v44_v33  ;;  %v217_v9 = vmax.f32 %v213_v51, %v215_v62 }
 0x1a4   :  { %v218_v57 = vadd.f32 %v216_v49, %v44_v33  ;;  %v344_v61 = vadd.f32 %v342_v50, %v1895_v32  ;;  %v406_v11 = vadd.f32 %v404_v7, %v44_v33  ;;  %v405_v16 = vmax.f32 %v401_v10, %v403_v13  ;;  %v98_v49 = vpop.f32.mrf.mxu2 }
 0x1a5   :  { %v287_v46 = vsel %vm220_vm2, %v1901_v40, -inf  ;;  %v345_v47 = vsel %vm220_vm2, %v1903_v41, -inf  ;;  %v284_v48 = vsel %vm220_vm2, %v282_v42, -inf  ;;  %v219_v12 = vadd.f32 %v217_v9, %v1895_v32 }
 0x1a6   :  { %288 = vmax.xlane.f32.xlu1 %v287_v46  ;;  %346 = vmax.xlane.f32.xlu2 %v345_v47  ;;  %v221_v5 = vsel %vm220_vm2, %v218_v57, -inf  ;;  %v348_v8 = vsel %vm220_vm2, %v344_v61, -inf  ;;  %v408_v14 = vsel %vm220_vm2, %v406_v11, -inf  ;;  %v407_v17 = vadd.f32 %v405_v16, %v1895_v32 }
 0x1a7   :  { %285 = vmax.xlane.f32.xlu0 %v284_v48  ;;  %v224_v15 = vsel %vm220_vm2, %v219_v12, -inf  ;;  %v159_v56 = vpack.c.bf16 %v112_v45, %v98_v49  ;;  %v1671_v45 = vld [vmem:[#allocation2 + $0x164] sm:$0xf0] }
 0x1a8   :  { %v411_v18 = vsel %vm220_vm2, %v407_v17, -inf }
 0x1a9   :  { %v246_v59 = vunpack.c.l.b16 %v159_v56  ;;  %v307_v60 = vunpack.c.h.b16 %v159_v56  ;;  %v1637_v56 = vld [vmem:[#allocation2 + $0x54] sm:$0xf0] }
 0x1ac   :  { %v100_v58 = vpop.f32.mrf.mxu2 }
 0x1ae   :  { %222 = vmax.xlane.f32.xlu1 %v221_v5 }
 0x1af   :  { %349 = vmax.xlane.f32.xlu0 %v348_v8  ;;  %v140_v8 = vpop.f32.mrf.mxu3 }
 0x1b4   :  { %v126_v7 = vpop.f32.mrf.mxu2 }
 0x1b5   :  { %v160_v9 = vpack.c.bf16 %v140_v8, %v126_v7 }
 0x1b6   :  { %409 = vmax.xlane.f32.xlu1 %v408_v14 }
 0x1b7   :  { %225 = vmax.xlane.f32.xlu0 %v224_v15  ;;  %v431_v13 = vunpack.c.h.b16 %v160_v9 }
 0x1bc   :  { %v128_v10 = vpop.f32.mrf.mxu2 }
 0x1bf   :  { %412 = vmax.xlane.f32.xlu0 %v411_v18 }
 0x219   :  { %v289_v19 = vpop.xlane.xlu1 %288  ;;  %v347_v22 = vpop.xlane.xlu2 %346 }
 0x21a   :  { %v291_v20 = vsub.f32 %v1901_v40, %v289_v19  ;;  %v286_v21 = vpop.xlane.xlu0 %285  ;;  %v351_v26 = vsub.f32 %v1903_v41, %v347_v22  ;;  %v1657_v22 = vld [vmem:[#allocation2 + $0xf4] sm:$0xf0] }
 0x21b   :  { %v290_v23 = vsub.f32 %v282_v42, %v286_v21  ;;  %v1425_v21 = vld [vmem:[#allocation2 + $0xf0] sm:$0xf] }
 0x21c   :  { %v294_v24 = vmul.f32 1.442695, %v291_v20  ;;  %v353_v28 = vmul.f32 1.442695, %v351_v26  ;;  %v1655_v26 = vld [vmem:[#allocation2 + $0xe4] sm:$0xf0] }
 0x21d   :  { %v292_v25 = vmul.f32 1.442695, %v290_v23  ;;  %v1417_v23 = vld [vmem:[#allocation2 + $0xe0] sm:$0xf] }
 0x21e   :  { %1728 = vpow2.f32 %v294_v24 }
 0x21f   :  { %1730 = vpow2.f32 %v292_v25  ;;  %v1426_v25 = vor.u32 %v1657_v22, %v1425_v21  ;;  %v1457_v22 = vld [vmem:[#allocation2 + $0x130] sm:$0xf] }
 0x220   :  { %1732 = vpow2.f32 %v353_v28  ;;  %v1489_v28 = vld [vmem:[#allocation2 + $0x170] sm:$0xf] }
 0x221   :  { %v223_v27 = vpop.xlane.xlu1 %222 }
 0x222   :  { %v350_v29 = vpop.xlane.xlu0 %349  ;;  %v227_v34 = vsub.f32 %v218_v57, %v223_v27  ;;  %v114_v57 = vpop.f32.mrf.mxu1 }
 0x223   :  { %v352_v30 = vsub.f32 %v344_v61, %v350_v29  ;;  %v161_v61 = vpack.c.bf16 %v114_v57, %v100_v58  ;;  %v1673_v29 = vld [vmem:[#allocation2 + $0x174] sm:$0xf0]  ;;  %v1401_v58 = vld [vmem:[#allocation2 + $0xc0] sm:$0xf] }
 0x224   :  { %v1938_v31 = vpop.eup %1728  ;;  %v229_v36 = vmul.f32 1.442695, %v227_v34  ;;  %v1418_v34 = vor.u32 %v1655_v26, %v1417_v23  ;;  %v1689_v57 = vld [vmem:[#allocation2 + $0x1f4] sm:$0xf0]  ;;  %v1329_v26 = vld [vmem:[#allocation2 + $0x30] sm:$0xf] }
 0x225   :  { %v355_v32 = vmul.f32 1.442695, %v352_v30  ;;  %v299_v6 = vsel %vm220_vm2, %v1938_v31, 0.0  ;;  %v1942_v33 = vpop.eup %1730  ;;  %v247_v0 = vunpack.c.l.b16 %v161_v61  ;;  %v308_v1 = vunpack.c.h.b16 %v161_v61  ;;  %v1361_v30 = vld [vmem:[#allocation2 + $0x70] sm:$0xf] }
 0x226   :  { %300 = vadd.xlane.f32.xlu0 %v299_v6  ;;  %v296_v35 = vsel %vm220_vm2, %v1942_v33, 0.0  ;;  %v1946_v40 = vpop.eup %1732  ;;  %v1665_v23 = vld [vmem:[#allocation2 + $0x134] sm:$0xf0] }
 0x227   :  { %1734 = vpow2.f32 %v355_v32  ;;  %297 = vadd.xlane.f32.xlu1 %v296_v35  ;;  %v357_v46 = vsel %vm220_vm2, %v1946_v40, 0.0  ;;  %v309_v4 = vpack.c.b16 %v308_v1, %v307_v60  ;;  %v248_v5 = vpack.c.b16 %v247_v0, %v246_v59  ;;  %v1409_v35 = vld [vmem:[#allocation2 + $0xd0] sm:$0xf]  ;;  %v1651_v59 = vld [vmem:[#allocation2 + $0xc4] sm:$0xf0] }
 0x228   :  { %1736 = vpow2.f32 %v229_v36  ;;  %v1653_v36 = vld [vmem:[#allocation2 + $0xd4] sm:$0xf0]  ;;  %v1465_v0 = vld [vmem:[#allocation2 + $0x140] sm:$0xf] }
 0x229   :  { %v410_v39 = vpop.xlane.xlu1 %409  ;;  %260 = vmatpush.bf16.msrb.mxu1 %v248_v5  ;;  %321 = vmatpush.bf16.msra.mxu2 %v309_v4  ;;  %v1545_v4 = vld [vmem:[#allocation2 + $0x1e0] sm:$0xf]  ;;  %v1687_v5 = vld [vmem:[#allocation2 + $0x1e4] sm:$0xf0] }
 0x22a   :  { %v226_v37 = vpop.xlane.xlu0 %225  ;;  %v414_v43 = vsub.f32 %v406_v11, %v410_v39  ;;  %v142_v11 = vpop.f32.mrf.mxu3 }
 0x22b   :  { %v228_v38 = vsub.f32 %v219_v12, %v226_v37  ;;  %v370_v12 = vunpack.c.l.b16 %v160_v9  ;;  %v162_v14 = vpack.c.bf16 %v142_v11, %v128_v10  ;;  %v1490_v37 = vor.u32 %v1673_v29, %v1489_v28  ;;  %v1337_v11 = vld [vmem:[#allocation2 + $0x40] sm:$0xf]  ;;  %v1647_v28 = vld [vmem:[#allocation2 + $0xa4] sm:$0xf0] }
 0x22c   :  { %v416_v47 = vmul.f32 1.442695, %v414_v43  ;;  %v1402_v10 = vor.u32 %v1651_v59, %v1401_v58  ;;  %v1458_v29 = vor.u32 %v1665_v23, %v1457_v22  ;;  %v1631_v58 = vld [vmem:[#allocation2 + $0x24] sm:$0xf0]  ;;  %v1513_v23 = vld [vmem:[#allocation2 + $0x1a0] sm:$0xf] }
 0x22d   :  { %v1948_v41 = vpop.eup %1734  ;;  %v231_v42 = vmul.f32 1.442695, %v228_v38  ;;  %v371_v15 = vunpack.c.l.b16 %v162_v14  ;;  %v432_v16 = vunpack.c.h.b16 %v162_v14  ;;  %880 = vmatpush.bf16.msrb.mxu2 %v1426_v25  ;;  %v1641_v38 = vld [vmem:[#allocation2 + $0x74] sm:$0xf0] }
 0x22e   :  { %v360_v44 = vsel %vm220_vm2, %v1948_v41, 0.0  ;;  %v1954_v51 = vpop.eup %1736  ;;  %v1362_v43 = vor.u32 %v1641_v38, %v1361_v30 }
 0x22f   :  { %1738 = vpow2.f32 %v231_v42  ;;  %361 = vadd.xlane.f32.xlu0 %v360_v44  ;;  %358 = vadd.xlane.f32.xlu1 %v357_v46  ;;  %v233_v55 = vsel %vm220_vm2, %v1954_v51, 0.0  ;;  %v433_v18 = vpack.c.b16 %v432_v16, %v431_v13  ;;  %v1481_v44 = vld [vmem:[#allocation2 + $0x160] sm:$0xf]  ;;  %v1546_v13 = vor.u32 %v1687_v5, %v1545_v4  ;;  %v1393_v16 = vld [vmem:[#allocation2 + $0xb0] sm:$0xf] }
 0x230   :  { %1740 = vpow2.f32 %v416_v47  ;;  %v1353_v46 = vld [vmem:[#allocation2 + $0x60] sm:$0xf]  ;;  %v1639_v47 = vld [vmem:[#allocation2 + $0x64] sm:$0xf0]  ;;  %866 = vmatpush.bf16.msra.mxu1 %v1362_v43  ;;  %v1377_v43 = vld [vmem:[#allocation2 + $0x90] sm:$0xf] }
 0x231   :  { %445 = vmatpush.bf16.msrb.mxu0 %v433_v18  ;;  %v1354_v49 = vor.u32 %v1639_v47, %v1353_v46  ;;  %881 = vmatpush.bf16.msrb.mxu2 %v1418_v34  ;;  %v1537_v18 = vld [vmem:[#allocation2 + $0x1d0] sm:$0xf]  ;;  %v1663_v34 = vld [vmem:[#allocation2 + $0x124] sm:$0xf0]  ;;  %v1369_v47 = vld [vmem:[#allocation2 + $0x80] sm:$0xf] }
 0x232   :  { %v413_v48 = vpop.xlane.xlu0 %412  ;;  %v1313_v5 = vld [vmem:[#allocation2 + $0x10] sm:$0xf] }
 0x233   :  { %v415_v50 = vsub.f32 %v407_v17, %v413_v48  ;;  %v372_v17 = vpack.c.b16 %v371_v15, %v370_v12  ;;  %v1635_v12 = vld [vmem:[#allocation2 + $0x44] sm:$0xf0] }
 0x234   :  { %867 = vmatpush.bf16.msra.mxu1 %v1354_v49 }
 0x235   :  { %v1956_v52 = vpop.eup %1738  ;;  %v418_v53 = vmul.f32 1.442695, %v415_v50  ;;  %384 = vmatpush.bf16.msrb.mxu3 %v372_v17  ;;  %v1473_v50 = vld [vmem:[#allocation2 + $0x150] sm:$0xf]  ;;  %v1649_v17 = vld [vmem:[#allocation2 + $0xb4] sm:$0xf0] }
 0x236   :  { %v236_v54 = vsel %vm220_vm2, %v1956_v52, 0.0  ;;  %v1962_v62 = vpop.eup %1740  ;;  %v1394_v25 = vor.u32 %v1649_v17, %v1393_v16  ;;  %v1411_v16 = vld [vmem:[#allocation2 + $0xd8] sm:$0xf0]  ;;  %v1672_v17 = vld [vmem:[#allocation2 + $0x174] sm:$0xf] }
 0x237   :  { %1742 = vpow2.f32 %v418_v53  ;;  %237 = vadd.xlane.f32.xlu0 %v236_v54  ;;  %234 = vadd.xlane.f32.xlu1 %v233_v55  ;;  %v420_v3 = vsel %vm220_vm2, %v1962_v62, 0.0  ;;  %v1669_v53 = vld [vmem:[#allocation2 + $0x154] sm:$0xf0]  ;;  %v1345_v54 = vld [vmem:[#allocation2 + $0x50] sm:$0xf]  ;;  %v1410_v55 = vor.u32 %v1653_v36, %v1409_v35 }
 0x238   :  { %v1474_v61 = vor.u32 %v1669_v53, %v1473_v50 }
 0x239   :  { %894 = vmatpush.bf16.msra.mxu3 %v1490_v37  ;;  %882 = vmatpush.bf16.msrb.mxu2 %v1410_v55  ;;  %v1656_v55 = vld [vmem:[#allocation2 + $0xf4] sm:$0xf] }
 0x23d   :  { %v1964_v63 = vpop.eup %1742  ;;  %883 = vmatpush.bf16.msrb.mxu2 %v1402_v10  ;;  %v1681_v10 = vld [vmem:[#allocation2 + $0x1b4] sm:$0xf0] }
 0x23e   :  { %v423_v2 = vsel %vm220_vm2, %v1964_v63, 0.0 }
 0x23f   :  { %424 = vadd.xlane.f32.xlu0 %v423_v2  ;;  %421 = vadd.xlane.f32.xlu1 %v420_v3  ;;  %v1346_v2 = vor.u32 %v1637_v56, %v1345_v54  ;;  %v1667_v3 = vld [vmem:[#allocation2 + $0x144] sm:$0xf0]  ;;  %v1427_v56 = vld [vmem:[#allocation2 + $0xf8] sm:$0xf0] }
 0x241   :  { %868 = vmatpush.bf16.msra.mxu1 %v1346_v2  ;;  %884 = vmatpush.bf16.msrb.mxu2 %v1394_v25 }
 0x299   :  { %v301_v19 = vpop.xlane.xlu0 %300 }
 0x29a   :  { %1744 = vrcp.f32 %v301_v19  ;;  %v298_v20 = vpop.xlane.xlu1 %297  ;;  %v1466_v19 = vor.u32 %v1667_v3, %v1465_v0  ;;  %v1654_v3 = vld [vmem:[#allocation2 + $0xe4] sm:$0xf] }
 0x29b   :  { %1746 = vrcp.f32 %v298_v20  ;;  %v1685_v20 = vld [vmem:[#allocation2 + $0x1d4] sm:$0xf0] }
 0x2a0   :  { %v1745_v24 = vpop.eup %1744 }
 0x2a1   :  { %v305_v27 = vmul.f32 %v1745_v24, %v1938_v31  ;;  %v1747_v32 = vpop.eup %1746  ;;  %v1482_v31 = vor.u32 %v1671_v45, %v1481_v44  ;;  %v1538_v24 = vor.u32 %v1685_v20, %v1537_v18  ;;  %v1645_v44 = vld [vmem:[#allocation2 + $0x94] sm:$0xf0]  ;;  %v1305_v20 = vld [vmem:[#allocation2] sm:$0xf] }
 0x2a2   :  { %v362_v6 = vpop.xlane.xlu0 %361  ;;  %v304_v39 = vmul.f32 %v1747_v32, %v1942_v33  ;;  %v359_v42 = vpop.xlane.xlu1 %358  ;;  %v1553_v33 = vld [vmem:[#allocation2 + $0x1f0] sm:$0xf] }
 0x2a3   :  { %1748 = vrcp.f32 %v362_v6  ;;  %v1554_v60 = vor.u32 %v1689_v57, %v1553_v33  ;;  %895 = vmatpush.bf16.msra.mxu3 %v1482_v31  ;;  %v1449_v6 = vld [vmem:[#allocation2 + $0x120] sm:$0xf]  ;;  %v1378_v31 = vor.u32 %v1645_v44, %v1377_v43  ;;  %v1430_v33 = vor.u32 %v1656_v55, %v1427_v56  ;;  %v1648_v43 = vld [vmem:[#allocation2 + $0xb4] sm:$0xf]  ;;  %v1395_v44 = vld [vmem:[#allocation2 + $0xb8] sm:$0xf0] }
 0x2a4   :  { %1750 = vrcp.f32 %v359_v42  ;;  %v306_v48 = vpack.c.bf16 %v305_v27, %v304_v39  ;;  %v1385_v27 = vld [vmem:[#allocation2 + $0xa0] sm:$0xf]  ;;  %v1450_v45 = vor.u32 %v1663_v34, %v1449_v6  ;;  %v1483_v6 = vld [vmem:[#allocation2 + $0x168] sm:$0xf0]  ;;  %v1505_v34 = vld [vmem:[#allocation2 + $0x190] sm:$0xf] }
 0x2a5   :  { %908 = vmatpush.bf16.msra.mxu0 %v1554_v60  ;;  %v1386_v38 = vor.u32 %v1647_v28, %v1385_v27  ;;  %v1321_v57 = vld [vmem:[#allocation2 + $0x20] sm:$0xf]  ;;  %v1650_v28 = vld [vmem:[#allocation2 + $0xc4] sm:$0xf]  ;;  %v1555_v55 = vld [vmem:[#allocation2 + $0x1f8] sm:$0xf0] }
 0x2a6   :  { %1300 = vmatmul.msk.bf16.vlgmr.msra.gmra.mxu2 %vm220_vm2, %v306_v48  ;;  %v1322_v59 = vor.u32 %v1631_v58, %v1321_v57  ;;  %v1529_v60 = vld [vmem:[#allocation2 + $0x1c0] sm:$0xf]  ;;  %v1387_v57 = vld [vmem:[#allocation2 + $0xa8] sm:$0xf0] }
 0x2a7   :  { %896 = vmatpush.bf16.msra.mxu3 %v1474_v61  ;;  %885 = vmatpush.bf16.msrb.mxu2 %v1386_v38  ;;  %v1683_v61 = vld [vmem:[#allocation2 + $0x1c4] sm:$0xf0]  ;;  %v1355_v38 = vld [vmem:[#allocation2 + $0x68] sm:$0xf0] }
 0x2a8   :  { %v1530_v0 = vor.u32 %v1683_v61, %v1529_v60  ;;  %v1467_v60 = vld [vmem:[#allocation2 + $0x148] sm:$0xf0] }
 0x2a9   :  { %v1749_v1 = vpop.eup %1748  ;;  %909 = vmatpush.bf16.msra.mxu0 %v1546_v13 }
 0x2aa   :  { %v1751_v7 = vpop.eup %1750  ;;  %v366_v8 = vmul.f32 %v1749_v1, %v1948_v41  ;;  %v238_v9 = vpop.xlane.xlu0 %237  ;;  %v1338_v41 = vor.u32 %v1635_v12, %v1337_v11  ;;  %v1441_v1 = vld [vmem:[#allocation2 + $0x110] sm:$0xf]  ;;  %v1433_v11 = vld [vmem:[#allocation2 + $0x100] sm:$0xf]  ;;  %v1659_v12 = vld [vmem:[#allocation2 + $0x104] sm:$0xf0] }
 0x2ab   :  { %v365_v14 = vmul.f32 %v1751_v7, %v1946_v40  ;;  %1752 = vrcp.f32 %v238_v9  ;;  %v235_v15 = vpop.xlane.xlu1 %234  ;;  %v1633_v40 = vld [vmem:[#allocation2 + $0x34] sm:$0xf0]  ;;  %897 = vmatpush.bf16.msra.mxu3 %v1466_v19  ;;  %886 = vmatpush.bf16.msrb.mxu2 %v1378_v31  ;;  %v1491_v19 = vld [vmem:[#allocation2 + $0x178] sm:$0xf0] }
 0x2ac   :  { %1754 = vrcp.f32 %v235_v15  ;;  %869 = vmatpush.bf16.msra.mxu1 %v1338_v41  ;;  %v1330_v32 = vor.u32 %v1633_v40, %v1329_v26  ;;  %v1629_v7 = vld [vmem:[#allocation2 + $0x14] sm:$0xf0]  ;;  %v1652_v15 = vld [vmem:[#allocation2 + $0xd4] sm:$0xf]  ;;  %v1494_v41 = vor.u32 %v1672_v17, %v1491_v19  ;;  %v1363_v40 = vld [vmem:[#allocation2 + $0x78] sm:$0xf0] }
 0x2ad   :  { %v367_v21 = vpack.c.bf16 %v366_v8, %v365_v14  ;;  %910 = vmatpush.bf16.msra.mxu0 %v1538_v24  ;;  %v1521_v8 = vld [vmem:[#allocation2 + $0x1b0] sm:$0xf]  ;;  %v1314_v9 = vor.u32 %v1629_v7, %v1313_v5  ;;  %v1434_v14 = vor.u32 %v1659_v12, %v1433_v11  ;;  %v1414_v18 = vor.u32 %v1652_v15, %v1411_v16  ;;  %v1679_v24 = vld [vmem:[#allocation2 + $0x1a4] sm:$0xf0]  ;;  %v1640_v26 = vld [vmem:[#allocation2 + $0x74] sm:$0xf] }
 0x2ae   :  { %v1522_v13 = vor.u32 %v1681_v10, %v1521_v8  ;;  %v1514_v25 = vor.u32 %v1679_v24, %v1513_v23  ;;  %v1366_v27 = vor.u32 %v1640_v26, %v1363_v40  ;;  %v1475_v31 = vld [vmem:[#allocation2 + $0x158] sm:$0xf0]  ;;  %v1664_v7 = vld [vmem:[#allocation2 + $0x134] sm:$0xf]  ;;  %v1642_v17 = vld [vmem:[#allocation2 + $0x84] sm:$0xf] }
 0x2af   :  { %1301 = vmatmul.msk.bf16.vlgmr.msrb.gmra.mxu3 %vm220_vm2, %v367_v21  ;;  %v1627_v21 = vld [vmem:[#allocation2 + $0x4] sm:$0xf0]  ;;  %v1379_v5 = vld [vmem:[#allocation2 + $0x98] sm:$0xf0]  ;;  %v1632_v11 = vld [vmem:[#allocation2 + $0x34] sm:$0xf] }
 0x2b0   :  { %898 = vmatpush.bf16.msra.mxu3 %v1458_v29  ;;  %870 = vmatpush.bf16.msra.mxu1 %v1330_v32  ;;  %v1306_v22 = vor.u32 %v1627_v21, %v1305_v20  ;;  %v1403_v29 = vld [vmem:[#allocation2 + $0xc8] sm:$0xf0]  ;;  %v1670_v32 = vld [vmem:[#allocation2 + $0x164] sm:$0xf]  ;;  %v1331_v12 = vld [vmem:[#allocation2 + $0x38] sm:$0xf0] }
 0x2b1   :  { %v1753_v30 = vpop.eup %1752  ;;  %911 = vmatpush.bf16.msra.mxu0 %v1530_v0  ;;  %v1634_v0 = vld [vmem:[#allocation2 + $0x44] sm:$0xf]  ;;  %v1539_v15 = vld [vmem:[#allocation2 + $0x1d8] sm:$0xf0]  ;;  %v1451_v21 = vld [vmem:[#allocation2 + $0x128] sm:$0xf0] }
 0x2b2   :  { %v1755_v35 = vpop.eup %1754  ;;  %v242_v36 = vmul.f32 %v1753_v30, %v1956_v52  ;;  %v425_v37 = vpop.xlane.xlu0 %424  ;;  %v1643_v52 = vld [vmem:[#allocation2 + $0x84] sm:$0xf0]  ;;  %v1406_v30 = vor.u32 %v1650_v28, %v1403_v29  ;;  %v1662_v19 = vld [vmem:[#allocation2 + $0x124] sm:$0xf]  ;;  %v1323_v23 = vld [vmem:[#allocation2 + $0x28] sm:$0xf0] }
 0x2b3   :  { %v241_v39 = vmul.f32 %v1755_v35, %v1954_v51  ;;  %1756 = vrcp.f32 %v425_v37  ;;  %v422_v42 = vpop.xlane.xlu1 %421  ;;  %v1370_v50 = vor.u32 %v1643_v52, %v1369_v47  ;;  %v1486_v35 = vor.u32 %v1670_v32, %v1483_v6  ;;  %v1638_v37 = vld [vmem:[#allocation2 + $0x64] sm:$0xf]  ;;  %v1497_v47 = vld [vmem:[#allocation2 + $0x180] sm:$0xf]  ;;  %v1675_v52 = vld [vmem:[#allocation2 + $0x184] sm:$0xf0] }
 0x2b4   :  { %1758 = vrcp.f32 %v422_v42  ;;  %899 = vmatpush.bf16.msra.mxu3 %v1450_v45  ;;  %871 = vmatpush.bf16.msra.mxu1 %v1322_v59  ;;  %v1358_v42 = vor.u32 %v1638_v37, %v1355_v38  ;;  %v1668_v45 = vld [vmem:[#allocation2 + $0x154] sm:$0xf]  ;;  %v1666_v59 = vld [vmem:[#allocation2 + $0x144] sm:$0xf]  ;;  %v1531_v26 = vld [vmem:[#allocation2 + $0x1c8] sm:$0xf0] }
 0x2b5   :  { %v243_v46 = vpack.c.bf16 %v242_v36, %v241_v39  ;;  %887 = vmatpush.bf16.msrb.mxu2 %v1370_v50  ;;  %912 = vmatpush.bf16.msra.mxu0 %v1522_v13  ;;  %v1677_v36 = vld [vmem:[#allocation2 + $0x194] sm:$0xf0]  ;;  %v1347_v50 = vld [vmem:[#allocation2 + $0x58] sm:$0xf0]  ;;  %v1470_v61 = vor.u32 %v1666_v59, %v1467_v60  ;;  %v1684_v13 = vld [vmem:[#allocation2 + $0x1d4] sm:$0xf] }
 0x2b6   :  { %v1506_v39 = vor.u32 %v1677_v36, %v1505_v34  ;;  %v1542_v16 = vor.u32 %v1684_v13, %v1539_v15  ;;  %v1682_v24 = vld [vmem:[#allocation2 + $0x1c4] sm:$0xf]  ;;  %v1443_v28 = vld [vmem:[#allocation2 + $0x118] sm:$0xf0]  ;;  %v1985_v29 = vld [vmem:[%s2120_s6] sm:$0xf] }
 0x2b7   :  { %1299 = vmatmul.msk.bf16.vlgmr.msrb.gmra.mxu1 %vm220_vm2, %v243_v46  ;;  %v1398_v46 = vor.u32 %v1648_v43, %v1395_v44  ;;  %v1534_v40 = vor.u32 %v1682_v24, %v1531_v26  ;;  %v1628_v6 = vld [vmem:[#allocation2 + $0x14] sm:$0xf]  ;;  %v1315_v34 = vld [vmem:[#allocation2 + $0x18] sm:$0xf0]  ;;  %v1658_v38 = vld [vmem:[#allocation2 + $0x104] sm:$0xf] }
 0x2b8   :  { %872 = vmatpush.bf16.msra.mxu1 %v1314_v9  ;;  %v1459_v9 = vld [vmem:[#allocation2 + $0x138] sm:$0xf0]  ;;  %v1318_v36 = vor.u32 %v1628_v6, %v1315_v34  ;;  %v1626_v44 = vld [vmem:[#allocation2 + $0x4] sm:$0xf] }
 0x2b9   :  { %v1757_v48 = vpop.eup %1756  ;;  %936 = vmatpush.bf16.msra.mxu2 %v1430_v33  ;;  %913 = vmatpush.bf16.msra.mxu0 %v1514_v25  ;;  %v1646_v33 = vld [vmem:[#allocation2 + $0xa4] sm:$0xf]  ;;  %v1462_v10 = vor.u32 %v1664_v7, %v1459_v9  ;;  %v1523_v37 = vld [vmem:[#allocation2 + $0x1b8] sm:$0xf0] }
 0x2ba   :  { %v1759_v49 = vpop.eup %1758  ;;  %v429_v51 = vmul.f32 %v1757_v48, %v1964_v63  ;;  %v1661_v63 = vld [vmem:[#allocation2 + $0x114] sm:$0xf0]  ;;  %v1478_v48 = vor.u32 %v1668_v45, %v1475_v31  ;;  %v1390_v58 = vor.u32 %v1646_v33, %v1387_v57  ;;  %v1307_v45 = vld [vmem:[#allocation2 + $0x8] sm:$0xf0]  ;;  %v455_v31 = vperm.slane %v1985_v29, 1 }
 0x2bb   :  { %v428_v53 = vmul.f32 %v1759_v49, %v1962_v62  ;;  %v1442_v2 = vor.u32 %v1661_v63, %v1441_v1  ;;  %v1419_v62 = vld [vmem:[#allocation2 + $0xe8] sm:$0xf0]  ;;  %v1498_v49 = vor.u32 %v1675_v52, %v1497_v47  ;;  %v1686_v63 = vld [vmem:[#allocation2 + $0x1e4] sm:$0xf]  ;;  %v1310_v52 = vor.u32 %v1626_v44, %v1307_v45 }
 0x2bc   :  { %v1422_v4 = vor.u32 %v1654_v3, %v1419_v62  ;;  %873 = vmatpush.bf16.msra.mxu1 %v1306_v22  ;;  %v1339_v1 = vld [vmem:[#allocation2 + $0x48] sm:$0xf0]  ;;  %v1630_v22 = vld [vmem:[#allocation2 + $0x24] sm:$0xf] }
 0x2bd   :  { %v430_v54 = vpack.c.bf16 %v429_v51, %v428_v53  ;;  %900 = vmatpush.bf16.msra.mxu3 %v1442_v2  ;;  %914 = vmatpush.bf16.msra.mxu0 %v1506_v39  ;;  %v1636_v51 = vld [vmem:[#allocation2 + $0x54] sm:$0xf]  ;;  %v1342_v2 = vor.u32 %v1634_v0, %v1339_v1  ;;  %v1547_v3 = vld [vmem:[#allocation2 + $0x1e8] sm:$0xf0]  ;;  %v1326_v25 = vor.u32 %v1630_v22, %v1323_v23  ;;  %v1674_v33 = vld [vmem:[#allocation2 + $0x184] sm:$0xf] }
 0x2be   :  { %937 = vmatpush.bf16.msra.mxu2 %v1422_v4  ;;  %v1688_v53 = vld [vmem:[#allocation2 + $0x1f4] sm:$0xf]  ;;  %v1550_v62 = vor.u32 %v1686_v63, %v1547_v3  ;;  %v1435_v39 = vld [vmem:[#allocation2 + $0x108] sm:$0xf0]  ;;  %v454_v63 = vperm.slane %v1985_v29, 0 }
 0x2bf   :  { %1302 = vmatmul.msk.bf16.vlgmr.msrb.gmra.mxu0 %vm220_vm2, %v430_v54  ;;  %v1350_v54 = vor.u32 %v1636_v51, %v1347_v50  ;;  %v1558_v56 = vor.u32 %v1688_v53, %v1555_v55  ;;  %v1644_v4 = vld [vmem:[#allocation2 + $0x94] sm:$0xf]  ;;  %v1438_v43 = vor.u32 %v1658_v38, %v1435_v39  ;;  %v1515_v47 = vld [vmem:[#allocation2 + $0x1a8] sm:$0xf0] }
 0x2c0   :  { %922 = vmatpush.bf16.msrb.mxu1 %v1366_v27  ;;  %v1382_v8 = vor.u32 %v1644_v4, %v1379_v5  ;;  %v1660_v27 = vld [vmem:[#allocation2 + $0x114] sm:$0xf]  ;;  %v1499_v57 = vld [vmem:[#allocation2 + $0x188] sm:$0xf0] }
 0x2c1   :  { %901 = vmatpush.bf16.msra.mxu3 %v1434_v14  ;;  %915 = vmatpush.bf16.msra.mxu0 %v1498_v49  ;;  %v1334_v14 = vor.u32 %v1632_v11, %v1331_v12  ;;  %v1676_v53 = vld [vmem:[#allocation2 + $0x194] sm:$0xf]  ;;  %v1502_v0 = vor.u32 %v1674_v33, %v1499_v57 }
 0x2c2   :  { %938 = vmatpush.bf16.msra.mxu2 %v1414_v18  ;;  %v1371_v18 = vld [vmem:[#allocation2 + $0x88] sm:$0xf0] }
 0x2c3   :  { %v1374_v20 = vor.u32 %v1642_v17, %v1371_v18 }
 0x2c4   :  { %923 = vmatpush.bf16.msrb.mxu1 %v1358_v42 }
 0x2c5   :  { %950 = vmatpush.bf16.msrb.mxu3 %v1494_v41  ;;  %964 = vmatpush.bf16.msrb.mxu0 %v1558_v56  ;;  %v1454_v41 = vor.u32 %v1662_v19, %v1451_v21 }
 0x2c6   :  { %939 = vmatpush.bf16.msra.mxu2 %v1406_v30  ;;  %v1446_v30 = vor.u32 %v1660_v27, %v1443_v28 }
 0x2c8   :  { %924 = vmatpush.bf16.msrb.mxu1 %v1350_v54  ;;  %v1507_v54 = vld [vmem:[#allocation2 + $0x198] sm:$0xf0] }
 0x2c9   :  { %951 = vmatpush.bf16.msrb.mxu3 %v1486_v35  ;;  %965 = vmatpush.bf16.msrb.mxu0 %v1550_v62  ;;  %v1680_v35 = vld [vmem:[#allocation2 + $0x1b4] sm:$0xf]  ;;  %v1510_v56 = vor.u32 %v1676_v53, %v1507_v54 }
 0x2ca   :  { %940 = vmatpush.bf16.msra.mxu2 %v1398_v46  ;;  %v1526_v42 = vor.u32 %v1680_v35, %v1523_v37  ;;  %v1678_v46 = vld [vmem:[#allocation2 + $0x1a4] sm:$0xf] }
 0x2cc   :  { %925 = vmatpush.bf16.msrb.mxu1 %v1342_v2 }
 0x2cd   :  { %952 = vmatpush.bf16.msrb.mxu3 %v1478_v48  ;;  %966 = vmatpush.bf16.msrb.mxu0 %v1542_v16  ;;  %v1518_v48 = vor.u32 %v1678_v46, %v1515_v47 }
 0x2ce   :  { %941 = vmatpush.bf16.msra.mxu2 %v1390_v58 }
 0x2d0   :  { %926 = vmatpush.bf16.msrb.mxu1 %v1334_v14  ;;  %v457_v14 = vperm.slane %v1985_v29, 3 }
 0x2d1   :  { %953 = vmatpush.bf16.msrb.mxu3 %v1470_v61  ;;  %967 = vmatpush.bf16.msrb.mxu0 %v1534_v40  ;;  %v456_v61 = vperm.slane %v1985_v29, 2 }
 0x2d2   :  { %942 = vmatpush.bf16.msra.mxu2 %v1382_v8 }
 0x2d4   :  { %927 = vmatpush.bf16.msrb.mxu1 %v1326_v25 }
 0x2d5   :  { %954 = vmatpush.bf16.msrb.mxu3 %v1462_v10  ;;  %968 = vmatpush.bf16.msrb.mxu0 %v1526_v42 }
 0x2d6   :  { %943 = vmatpush.bf16.msra.mxu2 %v1374_v20 }
 0x2d8   :  { %928 = vmatpush.bf16.msrb.mxu1 %v1318_v36 }
 0x2d9   :  { %955 = vmatpush.bf16.msrb.mxu3 %v1454_v41  ;;  %969 = vmatpush.bf16.msrb.mxu0 %v1518_v48 }
 0x2dc   :  { %929 = vmatpush.bf16.msrb.mxu1 %v1310_v52 }
 0x2dd   :  { %956 = vmatpush.bf16.msrb.mxu3 %v1446_v30  ;;  %970 = vmatpush.bf16.msrb.mxu0 %v1510_v56 }
 0x2e1   :  { %957 = vmatpush.bf16.msrb.mxu3 %v1438_v43  ;;  %971 = vmatpush.bf16.msrb.mxu0 %v1502_v0  ;;  %v1768_v0 = vld [vmem:[%s2115_s1 + $0x8] sm:$0xff] }
 0x329   :  { %v323_v32 = vpop.f32.mrf.mxu2 }
 0x32a   :  { %v463_v49 = vadd.f32 %v455_v31, %v323_v32 }
 0x32c   :  { %v471_v59 = vmax.f32 %v463_v49, 0.0 }
 0x331   :  { %v325_v51 = vpop.f32.mrf.mxu2 }
 0x332   :  { %v386_v50 = vpop.f32.mrf.mxu3  ;;  %v467_v55 = vadd.f32 %v455_v31, %v325_v51 }
 0x333   :  { %v464_v2 = vadd.f32 %v456_v61, %v386_v50 }
 0x334   :  { %v262_v58 = vpop.f32.mrf.mxu1  ;;  %v475_v60 = vmax.f32 %v467_v55, 0.0 }
 0x335   :  { %v462_v62 = vadd.f32 %v454_v63, %v262_v58  ;;  %v472_v8 = vmax.f32 %v464_v2, 0.0 }
 0x336   :  { %v479_v1 = vpack.c.bf16 %v475_v60, %v471_v59 }
 0x337   :  { %v470_v11 = vmax.f32 %v462_v62, 0.0 }
 0x338   :  { %888 = vmatmul.bf16.vlgmr.msrb.gmra.mxu2 %v479_v1 }
 0x33a   :  { %v388_v3 = vpop.f32.mrf.mxu3 }
 0x33b   :  { %v468_v4 = vadd.f32 %v456_v61, %v388_v3 }
 0x33c   :  { %v264_v5 = vpop.f32.mrf.mxu1  ;;  %v447_v7 = vpop.f32.mrf.mxu0 }
 0x33d   :  { %v476_v9 = vmax.f32 %v468_v4, 0.0  ;;  %v466_v10 = vadd.f32 %v454_v63, %v264_v5  ;;  %v465_v16 = vadd.f32 %v457_v14, %v447_v7  ;;  %v1769_v63 = vld [vmem:[%s2115_s1] sm:$0xff] }
 0x33f   :  { %v480_v12 = vpack.c.bf16 %v476_v9, %v472_v8  ;;  %v474_v13 = vmax.f32 %v466_v10, 0.0  ;;  %v473_v19 = vmax.f32 %v465_v16, 0.0 }
 0x341   :  { %v478_v15 = vpack.c.bf16 %v474_v13, %v470_v11  ;;  %902 = vmatmul.bf16.vlgmr.msra.gmra.mxu3 %v480_v12 }
 0x343   :  { %874 = vmatmul.bf16.vlgmr.msra.gmra.mxu1 %v478_v15 }
 0x344   :  { %v449_v17 = vpop.f32.mrf.mxu0 }
 0x345   :  { %v469_v18 = vadd.f32 %v457_v14, %v449_v17 }
 0x347   :  { %v477_v20 = vmax.f32 %v469_v18, 0.0 }
 0x348   :  { %944 = vmatmul.bf16.vlgmr.msra.gmra.mxu2 %v479_v1 }
 0x349   :  { %v481_v21 = vpack.c.bf16 %v477_v20, %v473_v19 }
 0x34b   :  { %916 = vmatmul.bf16.vlgmr.msra.gmra.mxu0 %v481_v21 }
 0x351   :  { %958 = vmatmul.bf16.vlgmr.msrb.gmra.mxu3 %v480_v12 }
 0x353   :  { %930 = vmatmul.bf16.vlgmr.msrb.gmra.mxu1 %v478_v15 }
 0x35b   :  { %972 = vmatmul.bf16.vlgmr.msrb.gmra.mxu0 %v481_v21 }
 0x3bb   :  { %v889_v41 = vpop.f32.mrf.mxu2 }
 0x3c0   :  { %v875_v22 = vpop.f32.mrf.mxu1 }
 0x3c1   :  { %v890_v27 = vadd.f32 %v889_v41, %v875_v22  ;;  %v1591_v41 = vld [vmem:[%s2119_s5 + $0x70] sm:$0xf]  ;;  %v1697_v22 = vld [vmem:[%s2119_s5 + $0x74] sm:$0xf0] }
 0x3c3   :  { %v891_v24 = vpop.f32.mrf.mxu2 }
 0x3c4   :  { %v903_v23 = vpop.f32.mrf.mxu3 }
 0x3c5   :  { %v904_v29 = vadd.f32 %v903_v23, %v890_v27  ;;  %v1587_v23 = vld [vmem:[%s2119_s5 + $0x60] sm:$0xf]  ;;  %v1695_v27 = vld [vmem:[%s2119_s5 + $0x54] sm:$0xf0] }
 0x3c8   :  { %v877_v25 = vpop.f32.mrf.mxu1  ;;  %v917_v26 = vpop.f32.mrf.mxu0 }
 0x3c9   :  { %v892_v28 = vadd.f32 %v891_v24, %v877_v25  ;;  %v918_v34 = vadd.f32 %v917_v26, %v904_v29  ;;  %v1592_v24 = vor.u32 %v1697_v22, %v1591_v41  ;;  %v1696_v25 = vld [vmem:[%s2119_s5 + $0x64] sm:$0xf0]  ;;  %v1579_v29 = vld [vmem:[%s2119_s5 + $0x40] sm:$0xf]  ;;  %v1727_v41 = vld [vmem:[%s2120_s6 + $0x6] ss:$0 sm:$0xff] }
 0x3ca   :  { %v1588_v26 = vor.u32 %v1696_v25, %v1587_v23 }
 0x3cb   :  { %v945_v36 = vpop.f32.mrf.mxu2  ;;  %1175 = vmatpush.bf16.msra.mxu3 %v1592_v24 }
 0x3cc   :  { %v905_v40 = vpop.f32.mrf.mxu3 }
 0x3cd   :  { %v906_v30 = vadd.f32 %v905_v40, %v892_v28  ;;  %v1583_v40 = vld [vmem:[%s2119_s5 + $0x50] sm:$0xf] }
 0x3ce   :  { %v1584_v28 = vor.u32 %v1695_v27, %v1583_v40 }
 0x3cf   :  { %1176 = vmatpush.bf16.msra.mxu3 %v1588_v26 }
 0x3d0   :  { %v919_v32 = vpop.f32.mrf.mxu0  ;;  %v931_v6 = vpop.f32.mrf.mxu1 }
 0x3d1   :  { %v920_v35 = vadd.f32 %v919_v32, %v906_v30  ;;  %v946_v39 = vadd.f32 %v945_v36, %v931_v6  ;;  %v1694_v30 = vld [vmem:[%s2119_s5 + $0x44] sm:$0xf0]  ;;  %v1575_v6 = vld [vmem:[%s2119_s5 + $0x30] sm:$0xf] }
 0x3d2   :  { %v1580_v32 = vor.u32 %v1694_v30, %v1579_v29 }
 0x3d3   :  { %v978_v37 = vpack.c.bf16 %v920_v35, %v918_v34  ;;  %v947_v46 = vpop.f32.mrf.mxu2  ;;  %1177 = vmatpush.bf16.msra.mxu3 %v1584_v28  ;;  %v1693_v34 = vld [vmem:[%s2119_s5 + $0x34] sm:$0xf0] }
 0x3d4   :  { %v959_v38 = vpop.f32.mrf.mxu3  ;;  %v1576_v35 = vor.u32 %v1693_v34, %v1575_v6 }
 0x3d5   :  { %1073 = vmatpush.bf16.msra.mxu1 %v978_v37  ;;  %v960_v42 = vadd.f32 %v959_v38, %v946_v39  ;;  %v1571_v37 = vld [vmem:[%s2119_s5 + $0x20] sm:$0xf]  ;;  %v1692_v38 = vld [vmem:[%s2119_s5 + $0x24] sm:$0xf0] }
 0x3d6   :  { %v1572_v39 = vor.u32 %v1692_v38, %v1571_v37 }
 0x3d7   :  { %1178 = vmatpush.bf16.msra.mxu3 %v1580_v32 }
 0x3d8   :  { %v973_v43 = vpop.f32.mrf.mxu0  ;;  %v933_v45 = vpop.f32.mrf.mxu1 }
 0x3d9   :  { %v974_v44 = vadd.f32 %v973_v43, %v960_v42  ;;  %v948_v47 = vadd.f32 %v947_v46, %v933_v45  ;;  %v1567_v42 = vld [vmem:[%s2119_s5 + $0x10] sm:$0xf]  ;;  %v1691_v43 = vld [vmem:[%s2119_s5 + $0x14] sm:$0xf0] }
 0x3da   :  { %v1568_v45 = vor.u32 %v1691_v43, %v1567_v42 }
 0x3db   :  { %981 = vrot.lane.b32.xlu1 %v974_v44, %s1830_s20  ;;  %1179 = vmatpush.bf16.msra.mxu3 %v1576_v35 }
 0x3dc   :  { %v961_v31 = vpop.f32.mrf.mxu3 }
 0x3dd   :  { %v962_v52 = vadd.f32 %v961_v31, %v948_v47 }
 0x3df   :  { %1180 = vmatpush.bf16.msra.mxu3 %v1572_v39 }
 0x3e0   :  { %v975_v48 = vpop.f32.mrf.mxu0 }
 0x3e1   :  { %v976_v49 = vadd.f32 %v975_v48, %v962_v52 }
 0x3e3   :  { %983 = vrot.lane.b32.xlu0 %v976_v49, %s1830_s20  ;;  %1020 = vperm.xlu1 %1724, %v974_v44   ;;  %v1725_v44 = vld [vmem:[%s2120_s6 + $0x4] ss:$0 sm:$0xff] }
 0x3e4   :  { %1181 = vmatpush.bf16.msra.mxu3 %v1568_v45 }
 0x3eb   :  { %1024 = vperm.xlu0 %1719, %v976_v49   ;;  %v1082_v49 = vld [vmem:[%s2116_s2] sm:$0x3] }
 0x44d   :  { %v982_v51 = vpop.permute.xlu1 %981 }
 0x44e   :  { %987 = vxpose.xlu1.b32.start [1/2] (short) (narrow) %v982_v51, 8  ;;  %v1563_v51 = vld [vmem:[%s2119_s5] sm:$0xf] }
 0x455   :  { %v984_v50 = vpop.permute.xlu0 %983  ;;  %v1021_v53 = vpop.permute.xlu1 %1020 }
 0x456   :  { %988 = vxpose.xlu1.b32.end [2/2] (short) (narrow) %v984_v50, 8  ;;  %v1690_v50 = vld [vmem:[%s2119_s5 + $0x4] sm:$0xf0] }
 0x45d   :  { %v1025_v56 = vpop.permute.xlu0 %1024 }
 0x4f2   :  { %v1003_v54 = vpop.trf.xlu1 }
 0x4f3   :  { %v1027_v55 = vperm.slane %v1003_v54, 0  ;;  %v1623_v54 = vld [vmem:[%s2119_s5 + $0x74] sm:$0xf] }
 0x4f5   :  { %v1028_v33 = vadd.f32 %v1027_v55, %v1021_v53  ;;  %v1029_v57 = vadd.f32 %v1027_v55, %v1025_v56  ;;  %v1564_v53 = vor.u32 %v1690_v50, %v1563_v51  ;;  %v1705_v55 = vld [vmem:[%s2119_s5 + $0x78] sm:$0xf0]  ;;  %v1619_v56 = vld [vmem:[%s2119_s5 + $0x64] sm:$0xf] }
 0x4f7   :  { %v1030_v58 = vmul.f32 0.2, %v1028_v33  ;;  %v1031_v59 = vmul.f32 0.2, %v1029_v57  ;;  %1182 = vmatpush.bf16.msra.mxu3 %v1564_v53 }
 0x4f9   :  { %v1032_v60 = vmax.f32 %v1028_v33, %v1030_v58  ;;  %v1033_v61 = vmax.f32 %v1029_v57, %v1031_v59  ;;  %v1624_v33 = vor.u32 %v1705_v55, %v1623_v54  ;;  %v1704_v57 = vld [vmem:[%s2119_s5 + $0x68] sm:$0xf0]  ;;  %v1615_v59 = vld [vmem:[%s2119_s5 + $0x54] sm:$0xf] }
 0x4fa   :  { %v1620_v58 = vor.u32 %v1704_v57, %v1619_v56 }
 0x4fb   :  { %v1035_v1 = vadd.f32 %v1768_v0, %v1033_v61  ;;  %v1034_v2 = vadd.f32 %v1769_v63, %v1032_v60  ;;  %1258 = vmatpush.bf16.msra.mxu0 %v1624_v33  ;;  %v1703_v60 = vld [vmem:[%s2119_s5 + $0x58] sm:$0xf0]  ;;  %v1611_v0 = vld [vmem:[%s2119_s5 + $0x44] sm:$0xf] }
 0x4fc   :  { %v1616_v61 = vor.u32 %v1703_v60, %v1615_v59 }
 0x4fd   :  { %v1039_v3 = vsel %vm220_vm2, %v1035_v1, -inf  ;;  %v1036_v62 = vsel %vm220_vm2, %v1034_v2, -inf }
 0x4fe   :  { %1040 = vmax.xlane.f32.xlu2 %v1039_v3  ;;  %1037 = vmax.xlane.f32.xlu0 %v1036_v62  ;;  %v1701_v3 = vld [vmem:[%s2119_s5 + $0x38] sm:$0xf0] }
 0x4ff   :  { %1259 = vmatpush.bf16.msra.mxu0 %v1620_v58 }
 0x503   :  { %1260 = vmatpush.bf16.msra.mxu0 %v1616_v61 }
 0x571   :  { %v1038_v4 = vpop.xlane.xlu0 %1037  ;;  %v1041_v5 = vpop.xlane.xlu2 %1040 }
 0x572   :  { %v1042_v7 = vsub.f32 %v1034_v2, %v1038_v4  ;;  %v1043_v9 = vsub.f32 %v1035_v1, %v1041_v5  ;;  %v1702_v1 = vld [vmem:[%s2119_s5 + $0x48] sm:$0xf0]  ;;  %v1607_v2 = vld [vmem:[%s2119_s5 + $0x34] sm:$0xf]  ;;  %v1603_v4 = vld [vmem:[%s2119_s5 + $0x24] sm:$0xf] }
 0x573   :  { %v1612_v63 = vor.u32 %v1702_v1, %v1611_v0  ;;  %v1608_v62 = vor.u32 %v1701_v3, %v1607_v2  ;;  %v1700_v5 = vld [vmem:[%s2119_s5 + $0x28] sm:$0xf0] }
 0x574   :  { %v1044_v8 = vmul.f32 1.442695, %v1042_v7  ;;  %v1046_v10 = vmul.f32 1.442695, %v1043_v9  ;;  %v1604_v7 = vor.u32 %v1700_v5, %v1603_v4 }
 0x575   :  { %1261 = vmatpush.bf16.msra.mxu0 %v1612_v63 }
 0x576   :  { %1760 = vpow2.f32 %v1044_v8 }
 0x577   :  { %1762 = vpow2.f32 %v1046_v10  ;;  %v1599_v10 = vld [vmem:[%s2119_s5 + $0x14] sm:$0xf] }
 0x579   :  { %1262 = vmatpush.bf16.msra.mxu0 %v1608_v62 }
 0x57c   :  { %v1761_v11 = vpop.eup %1760 }
 0x57d   :  { %v1048_v12 = vsel %vm220_vm2, %v1761_v11, 0.0  ;;  %v1763_v13 = vpop.eup %1762  ;;  %1263 = vmatpush.bf16.msra.mxu0 %v1604_v7 }
 0x57e   :  { %1049 = vadd.xlane.f32.xlu2 %v1048_v12  ;;  %v1051_v14 = vsel %vm220_vm2, %v1763_v13, 0.0 }
 0x586   :  { %1052 = vadd.xlane.f32.xlu2 %v1051_v14  ;;  %v1698_v14 = vld [vmem:[%s2119_s5 + $0x8] sm:$0xf0] }
 0x5f1   :  { %v1050_v15 = vpop.xlane.xlu2 %1049 }
 0x5f2   :  { %1764 = vrcp.f32 %v1050_v15 }
 0x5f8   :  { %v1765_v17 = vpop.eup %1764 }
 0x5f9   :  { %v1053_v16 = vpop.xlane.xlu2 %1052  ;;  %v1056_v19 = vmul.f32 %v1765_v17, %v1761_v11  ;;  %v1699_v11 = vld [vmem:[%s2119_s5 + $0x18] sm:$0xf0] }
 0x5fa   :  { %1766 = vrcp.f32 %v1053_v16  ;;  %v1600_v12 = vor.u32 %v1699_v11, %v1599_v10  ;;  %v1726_v16 = vld [vmem:[%s2120_s6 + $0x5] ss:$0 sm:$0xff] }
 0x5fc   :  { %1264 = vmatpush.bf16.msra.mxu0 %v1600_v12 }
 0x600   :  { %v1767_v18 = vpop.eup %1766 }
 0x601   :  { %v1057_v20 = vmul.f32 %v1767_v18, %v1763_v13  ;;  %v1595_v13 = vld [vmem:[%s2119_s5 + $0x4] sm:$0xf] }
 0x602   :  { %v1596_v15 = vor.u32 %v1698_v14, %v1595_v13 }
 0x603   :  { %v1058_v21 = vpack.c.bf16 %v1057_v20, %v1056_v19 }
 0x604   :  { %1265 = vmatpush.bf16.msra.mxu0 %v1596_v15 }
 0x605   :  { %1559 = vmatmul.msk.bf16.vlgmr.msra.gmra.mxu1 %vm220_vm2, %v1058_v21 }
 0x682   :  { %v1075_v36 = vpop.f32.mrf.mxu1 }
 0x683   :  { %v1076_v31 = vadd.f32 %v1725_v44, %v1075_v36 }
 0x685   :  { %v1080_v48 = vmax.f32 %v1076_v31, 0.0 }
 0x68a   :  { %v1077_v46 = vpop.f32.mrf.mxu1 }
 0x68b   :  { %v1078_v47 = vadd.f32 %v1725_v44, %v1077_v46 }
 0x68d   :  { %v1081_v52 = vmax.f32 %v1078_v47, 0.0 }
 0x68f   :  { %1100 = vmatpush.msrb.mxu2 %v1081_v52 }
 0x691   :  { %1101 = vmatpush.msrb.mxu2 %v1080_v48 }
 0x692   :  { %1560 = vmatmul.msk.f32.vlgmr.msrb.gmra.mxu2 %vm220_vm2, %v1082_v49 }
 0x715   :  { %v1103_v8 = vpop.f32.mrf.mxu2 }
 0x716   :  { %v1106_v9 = vpack.c.bf16 %v1103_v8, %v1103_v8 }
 0x718   :  { %1183 = vmatmul.bf16.vlgmr.msra.gmra.mxu3 %v1106_v9 }
 0x79b   :  { %v1184_v17 = vpop.f32.mrf.mxu3 }
 0x79c   :  { %v1185_v18 = vadd.f32 %v1726_v16, %v1184_v17 }
 0x79e   :  { %v1188_v19 = vmax.f32 %v1185_v18, 0.0 }
 0x7a0   :  { %v1189_v20 = vpack.c.bf16 %v1188_v19, %v1188_v19 }
 0x7a2   :  { %1266 = vmatmul.bf16.vlgmr.msra.gmra.mxu0 %v1189_v20 }
 0x7a3   :  { %v1186_v21 = vpop.f32.mrf.mxu3 }
 0x81f   :  { %v1267_v22 = vpop.f32.mrf.mxu0 }
 0x820   :  { %v1268_v23 = vadd.f32 %v1727_v41, %v1267_v22 }
 0x822   :  { %1272 = vst.msk [vmem:[#allocation5] sm:$0x3] %vm1271_vm3, %v1268_v23 }
 0x823   :  { %1283 = dma.vmem_to_hbm [thread:$0]  %s1279_s16, 32, %s1281_s18, [#allocation4]  }
 0x827   :  { %v1269_v24 = vpop.f32.mrf.mxu0 }
 0x828   :  { %1820 = dma.done.wait [#allocation4], 32  }
 0x829   :  { %1821 = vsyncadd [#allocation4], 4294967264 }
 0x82a   :  { %1288 = vsyncpa [#allocation3], 1 }
 0x82b   :  { %1289 = vsyncpa [#allocation4], 1 }

</bundles_post_ra>
